<compile_context>
chip_gen: v7x
topology: tpu7x:2x2x1
jax: 0.10.0
libtpu: 0.0.40
codegen_flags: <defaults>
</compile_context>

<pallas_src>
import math
from functools import partial

import jax
import jax.numpy as jnp
from jax.experimental import pallas as pl
from jax.experimental.pallas import tpu as pltpu


# ----------------------------------------------------------------------------
# Kernel
# ----------------------------------------------------------------------------
def gru_model_kernel(frames_ref, perm_ref, wf_ref, bf_ref,
                     wih_ref, bih_ref, whh_ref, bhh_ref,
                     wkvq_ref, bkvq_ref, red_ref, exp_ref, sumr_ref,
                     wc_ref, bc_ref, lna_ref, lnb_ref,
                     out_ref,
                     *, B, S, F, H, A, P, C, ln_eps):
    f32 = jnp.float32

    def sigmoid(x):                           # one EUP tanh, no exp + divide
        return 0.5 * (jnp.tanh(0.5 * x) + 1.0)

    # ---------------- Frame2Segment: avg-pool(k=5, s=5) ----------------------
    # 5 strided-slice adds per batch element (VPU); the 1/5 scale is folded into
    # the frontend weight.  Batch->time-major interleave = tiny constant matmul.
    pooled_parts = []
    for b in range(B):
        acc = frames_ref[pl.ds(b * F, S, stride=5), :]
        for k in range(1, 5):
            acc = acc + frames_ref[pl.ds(b * F + k, S, stride=5), :]
        pooled_parts.append(acc)                               # (S, Dc), rows = t
    pooled_bb = jnp.concatenate(pooled_parts, axis=0)          # (B*S, Dc), row b*S+t
    pooled = jnp.dot(perm_ref[...], pooled_bb,
                     preferred_element_type=f32)               # (S*B, Dc), row t*B+b

    # ---------------- fused dense + eval-BN (+pool scale) + ReLU -------------
    seg_in = jnp.maximum(
        jnp.dot(pooled, wf_ref[...], preferred_element_type=f32) + bf_ref[...],
        0.0)                                                   # (S*B, Din)

    # ---------------- GRU: input projection for all timesteps at once --------
    gx = jnp.dot(seg_in, wih_ref[...], preferred_element_type=f32) + bih_ref[...]
    whh = whh_ref[...]
    bhh = bhh_ref[...]
    h = jnp.zeros((B, H), f32)
    h_list = []
    for t in range(S):                        # fully unrolled, S is small
        gx_t = gx[t * B:(t + 1) * B, :]
        gh_t = jnp.dot(h, whh, preferred_element_type=f32) + bhh
        r = sigmoid(gx_t[:, :H] + gh_t[:, :H])
        z = sigmoid(gx_t[:, H:2 * H] + gh_t[:, H:2 * H])
        n = jnp.tanh(gx_t[:, 2 * H:] + r * gh_t[:, 2 * H:])
        h = n + z * (h - n)                   # == (1-z)*n + z*h
        h_list.append(h)                      # kept live in vregs, no scratch

    # lane-stacked GRU states: (B, S*H), lane = t*H + j
    seg = jnp.concatenate(h_list, axis=1)

    # ---------------- Classifier: block-diagonal K/V/Q projection ------------
    SP = S * P
    proj = jnp.dot(seg, wkvq_ref[...], preferred_element_type=f32) + bkvq_ref[...]
    K = proj[:, :SP]                          # (B, S*P)    lane t*P+p
    V = proj[:, SP:2 * SP]                    # (B, S*P)
    Q = proj[:, 2 * SP:]                      # (B, A*S*P)  lane a*S*P+t*P+p

    K_rep = jnp.concatenate([K] * A, axis=1)  # (B, A*S*P)
    # grouped lane-reduce over P -> (B, A*S), lane a*S+t (1/sqrt(P) pre-folded)
    scores_bas = jnp.dot(Q * K_rep, red_ref[...], preferred_element_type=f32)

    # (A*B, S) slab: row a*B+b, lane t -> ONE softmax for all heads / batch rows
    scores_slab = jnp.concatenate(
        [scores_bas[:, a * S:(a + 1) * S] for a in range(A)], axis=0)
    m = jnp.max(scores_slab, axis=1, keepdims=True)
    e = jnp.exp(scores_slab - m)
    attn_slab = e / jnp.sum(e, axis=1, keepdims=True)   # exact (feeds argmax path)

    # weighted sum over segments for every (head, batch) row: two small matmuls
    attn_exp = jnp.dot(attn_slab, exp_ref[...],
                       preferred_element_type=f32)       # (A*B, S*P)
    V_rep = jnp.concatenate([V] * A, axis=0)             # (A*B, S*P)
    ws = jnp.dot(attn_exp * V_rep, sumr_ref[...],
                 preferred_element_type=f32)             # (A*B, P)

    # conv1d(kernel=d_proj) == linear over P, for all heads at once, then LayerNorm
    logits = jnp.dot(jnp.maximum(ws, 0.0), wc_ref[...],
                     preferred_element_type=f32) + bc_ref[...]       # (A*B, C)
    mu = jnp.mean(logits, axis=1, keepdims=True)
    std = jnp.sqrt(jnp.sum((logits - mu) ** 2, axis=1, keepdims=True) / (C - 1))
    ln = lna_ref[...] * (logits - mu) * pl.reciprocal(std + ln_eps) + lnb_ref[...]

    # max / argmax over heads: A-1 compares on (B, C) blocks ('>' keeps first max)
    vmax = ln[:B, :]
    vidx = jnp.zeros((B, C), f32)
    for a in range(1, A):
        blk = ln[a * B:(a + 1) * B, :]
        upd = blk > vmax
        vidx = jnp.where(upd, jnp.float32(a), vidx)
        vmax = jnp.where(upd, blk, vmax)
    probs = sigmoid(vmax)

    # ---------------- single lane-dense output slab (A*B, 128) ----------------
    pad = jnp.zeros((A * B - B, C), f32)
    tail = jnp.zeros((A * B, 128 - 2 * S - 2 * C), f32)
    out_ref[...] = jnp.concatenate(
        [scores_slab,                                   # lanes [0, S)
         attn_slab,                                     # lanes [S, 2S)
         jnp.concatenate([probs, pad], axis=0),         # lanes [2S, 2S+C), rows [0,B)
         jnp.concatenate([vidx, pad], axis=0),          # lanes [2S+C, 2S+2C)
         tail], axis=1)


# ----------------------------------------------------------------------------
# Wrapper: host-side parameter packing / folding + pallas_call
# ----------------------------------------------------------------------------
def gru_model_forward(rgb, audio, params, cfg):
    B, F, _ = rgb.shape
    assert F % 5 == 0, "frame_length must be a multiple of the pool size (5)"
    S = F // 5
    H = cfg["d_model"]
    P = cfg["d_proj"]
    A = cfg["n_attns"]
    C = cfg["num_classes"]
    d_rgb, d_aud = cfg["d_rgb"], cfg["d_audio"]
    Din = d_rgb + d_aud
    eps_bn = 1e-5
    assert 2 * S + 2 * C <= 128, "output slab packing assumes 2*S + 2*C <= 128"
    f32 = jnp.float32

    # concat modalities once; flatten batch-major (row = b*F + f)
    frames = jnp.concatenate([rgb, audio], axis=-1).astype(f32)
    Dc = frames.shape[-1]
    frames_flat = frames.reshape(B * F, Dc)

    # batch-blocked (b*S+t) -> time-major (t*B+b) row permutation (tiny constant)
    rows = jnp.array([t * B + b for t in range(S) for b in range(B)])
    cols = jnp.array([b * S + t for t in range(S) for b in range(B)])
    perm = jnp.zeros((S * B, B * S), f32).at[rows, cols].set(1.0)

    # fold eval-mode BatchNorm into the dense layers; block-diagonal over modalities;
    # the avg-pool 1/5 scale is folded into the weight as well.
    def fold_bn(w, b, bn):
        gamma, beta, mean, var = bn
        scale = gamma / jnp.sqrt(var + eps_bn)
        return (w * scale[:, None]).T, (b - mean) * scale + beta

    wr, br = fold_bn(params["w_rgb"], params["b_rgb"], params["bn_rgb"])
    wa, ba = fold_bn(params["w_aud"], params["b_aud"], params["bn_aud"])
    wf = jnp.zeros((Dc, Din), f32)
    wf = wf.at[:wr.shape[0], :d_rgb].set(wr)
    wf = wf.at[wr.shape[0]:, d_rgb:].set(wa)
    wf = wf * 0.2
    bf = jnp.concatenate([br, ba]).reshape(1, Din)

    # GRU weights, transposed to (in, out)
    wih, whh, bih, bhh = params["gru"]
    wih_t, whh_t = wih.T, whh.T
    bih2, bhh2 = bih.reshape(1, -1), bhh.reshape(1, -1)

    # block-diagonal K/V/Q projection over the lane-stacked (B, S*H) GRU states:
    #   K, V -> (B, S*P) lane t*P+p ;  Q -> (B, A*S*P) lane a*S*P+t*P+p
    # 1/sqrt(d_proj) folded into the query weights/biases.
    I_S = jnp.eye(S, dtype=f32)
    scale_q = 1.0 / math.sqrt(P)
    wk, bk = params["key"]
    wv, bv = params["value"]
    wq_blocks = [jnp.kron(I_S, wq.T * scale_q) for wq, _ in params["queries"]]
    wkvq = jnp.concatenate(
        [jnp.kron(I_S, wk.T), jnp.kron(I_S, wv.T)] + wq_blocks, axis=1)
    bq_blocks = [jnp.tile(bq * scale_q, S) for _, bq in params["queries"]]
    bkvq = jnp.concatenate(
        [jnp.tile(bk, S), jnp.tile(bv, S)] + bq_blocks).reshape(1, -1)

    # constant 0/1 helpers: grouped lane reduce / lane expand / segment sum
    red = jnp.kron(jnp.eye(A * S, dtype=f32), jnp.ones((P, 1), f32))   # (A*S*P, A*S)
    expd = jnp.kron(I_S, jnp.ones((1, P), f32))                        # (S, S*P)
    sumr = jnp.kron(jnp.ones((S, 1), f32), jnp.eye(P, dtype=f32))      # (S*P, P)

    wc = params["conv_w"][:, 0, :].T                                   # (P, C)
    bc = params["conv_b"].reshape(1, C)
    ln_a = params["ln_a"].reshape(1, C)
    ln_b = params["ln_b"].reshape(1, C)

    inputs = (frames_flat, perm, wf, bf, wih_t, bih2, whh_t, bhh2,
              wkvq, bkvq, red, expd, sumr, wc, bc, ln_a, ln_b)

    kernel = partial(gru_model_kernel, B=B, S=S, F=F, H=H, A=A, P=P, C=C,
                     ln_eps=1e-6)
    vmem = pltpu.MemorySpace.VMEM
    slab = pl.pallas_call(
        kernel,
        out_shape=jax.ShapeDtypeStruct((A * B, 128), f32),
        in_specs=[pl.BlockSpec(memory_space=vmem)] * len(inputs),
        out_specs=pl.BlockSpec(memory_space=vmem),
    )(*inputs)

    # unpack the lane-dense output slab (layout plumbing only)
    scores = slab[:, :S].reshape(A, B, S).transpose(1, 2, 0)           # (B, S, A)
    attn_weights = slab[:, S:2 * S].reshape(A, B, S).transpose(1, 2, 0)
    vid_probs = slab[:B, 2 * S:2 * S + C]
    attn_idc = slab[:B, 2 * S + C:2 * S + 2 * C].astype(jnp.int32)

    # conv_loss depends only on the conv parameters -> computed outside the kernel
    cp = jax.nn.softmax(jnp.sum(wc, axis=0) + params["conv_b"])
    conv_loss = jnp.clip(jnp.std(cp, ddof=1), 1e-9, 1e9) * B

    return vid_probs, attn_idc, scores, attn_weights, conv_loss


# ----------------------------------------------------------------------------
# Pure-JAX reference (mirrors the PyTorch module, eval mode)
# ----------------------------------------------------------------------------
def reference_forward(rgb, audio, params, cfg):
    B, F, _ = rgb.shape
    S = F // 5
    H = cfg["d_model"]
    P = cfg["d_proj"]
    C = cfg["num_classes"]
    eps_bn = 1e-5

    def pool(x):
        return x.reshape(B, S, 5, x.shape[-1]).mean(axis=2)

    def dense_bn_relu(x, w, b, bn):
        gamma, beta, mean, var = bn
        y = x @ w.T + b
        y = gamma * (y - mean) / jnp.sqrt(var + eps_bn) + beta
        return jnp.maximum(y, 0.0)

    seg_rgb = dense_bn_relu(pool(rgb), params["w_rgb"], params["b_rgb"], params["bn_rgb"])
    seg_aud = dense_bn_relu(pool(audio), params["w_aud"], params["b_aud"], params["bn_aud"])
    x = jnp.concatenate([seg_rgb, seg_aud], axis=-1)                   # (B, S, Din)

    wih, whh, bih, bhh = params["gru"]

    def sigmoid(v):
        return 1.0 / (1.0 + jnp.exp(-v))

    def gru_step(h, x_t):
        gx = x_t @ wih.T + bih
        gh = h @ whh.T + bhh
        r = sigmoid(gx[:, :H] + gh[:, :H])
        z = sigmoid(gx[:, H:2 * H] + gh[:, H:2 * H])
        n = jnp.tanh(gx[:, 2 * H:] + r * gh[:, 2 * H:])
        h_new = (1.0 - z) * n + z * h
        return h_new, h_new

    _, hs = jax.lax.scan(gru_step, jnp.zeros((B, H), jnp.float32), jnp.swapaxes(x, 0, 1))
    seg = jnp.swapaxes(hs, 0, 1)                                       # (B, S, H)

    wk, bk = params["key"]
    wv, bv = params["value"]
    K = seg @ wk.T + bk
    V = seg @ wv.T + bv
    wc2 = params["conv_w"][:, 0, :]                                    # (C, P)
    bc = params["conv_b"]
    ln_a, ln_b = params["ln_a"], params["ln_b"]

    logits, scores, attns = [], [], []
    for wq, bq in params["queries"]:
        Q = seg @ wq.T + bq
        score = jnp.sum(Q * K, axis=-1) / math.sqrt(P)                 # (B, S)
        p = jax.nn.softmax(score, axis=-1)
        ws = jnp.sum(p[:, :, None] * V, axis=1)                        # (B, P)
        logit = jnp.maximum(ws, 0.0) @ wc2.T + bc                      # (B, C)
        mu = logit.mean(axis=-1, keepdims=True)
        std = jnp.sqrt(jnp.sum((logit - mu) ** 2, axis=-1, keepdims=True) / (C - 1))
        logits.append(ln_a * (logit - mu) / (std + 1e-6) + ln_b)
        scores.append(score)
        attns.append(p)

    L = jnp.stack(logits, axis=-1)                                     # (B, C, A)
    vid_probs = sigmoid(jnp.max(L, axis=-1))
    attn_idc = jnp.argmax(L, axis=-1).astype(jnp.int32)
    scores = jnp.stack(scores, axis=-1)                                # (B, S, A)
    attn_weights = jnp.stack(attns, axis=-1)

    cp = jnp.ones((B, P), jnp.float32) @ wc2.T + bc                    # (B, C)
    cp = jax.nn.softmax(cp, axis=1)
    conv_loss = jnp.clip(jnp.std(cp, axis=1, ddof=1), 1e-9, 1e9).sum()
    return vid_probs, attn_idc, scores, attn_weights, conv_loss, L


# ----------------------------------------------------------------------------
# Deterministic parameter init (mimics PyTorch defaults, eval-mode BN stats)
# ----------------------------------------------------------------------------
def init_params(key, cfg):
    ks = iter(jax.random.split(key, 16))

    def lin(k, out_f, in_f):
        bound = 1.0 / math.sqrt(in_f)
        kw, kb = jax.random.split(k)
        w = jax.random.uniform(kw, (out_f, in_f), jnp.float32, -bound, bound)
        b = jax.random.uniform(kb, (out_f,), jnp.float32, -bound, bound)
        return w, b

    def bn(k, n):
        k1, k2, k3, k4 = jax.random.split(k, 4)
        gamma = jax.random.uniform(k1, (n,), jnp.float32, 0.5, 1.5)
        beta = jax.random.uniform(k2, (n,), jnp.float32, -0.5, 0.5)
        mean = jax.random.normal(k3, (n,), jnp.float32) * 0.1
        var = jax.random.uniform(k4, (n,), jnp.float32, 0.5, 1.5)
        return (gamma, beta, mean, var)

    p = {}
    p["w_rgb"], p["b_rgb"] = lin(next(ks), cfg["d_rgb"], cfg["rgb_feature_size"])
    p["w_aud"], p["b_aud"] = lin(next(ks), cfg["d_audio"], cfg["audio_feature_size"])
    p["bn_rgb"] = bn(next(ks), cfg["d_rgb"])
    p["bn_aud"] = bn(next(ks), cfg["d_audio"])

    d_in = cfg["d_rgb"] + cfg["d_audio"]
    H = cfg["d_model"]
    bound = 1.0 / math.sqrt(H)
    kg = jax.random.split(next(ks), 4)
    p["gru"] = (jax.random.uniform(kg[0], (3 * H, d_in), jnp.float32, -bound, bound),
                jax.random.uniform(kg[1], (3 * H, H), jnp.float32, -bound, bound),
                jax.random.uniform(kg[2], (3 * H,), jnp.float32, -bound, bound),
                jax.random.uniform(kg[3], (3 * H,), jnp.float32, -bound, bound))

    p["key"] = lin(next(ks), cfg["d_proj"], H)
    p["value"] = lin(next(ks), cfg["d_proj"], H)
    p["queries"] = [lin(next(ks), cfg["d_proj"], H) for _ in range(cfg["n_attns"])]

    kc = jax.random.split(next(ks), 2)
    bc = 1.0 / math.sqrt(cfg["d_proj"])
    p["conv_w"] = jax.random.uniform(kc[0], (cfg["num_classes"], 1, cfg["d_proj"]),
                                     jnp.float32, -bc, bc)
    p["conv_b"] = jax.random.uniform(kc[1], (cfg["num_classes"],), jnp.float32, -bc, bc)
    p["ln_a"] = jnp.ones((cfg["num_classes"],), jnp.float32)
    p["ln_b"] = jnp.zeros((cfg["num_classes"],), jnp.float32)
    return p


if __name__ == "__main__":
    cfg = dict(rgb_feature_size=24, audio_feature_size=16, d_rgb=16, d_audio=16,
               d_model=32, d_proj=16, n_attns=4, num_classes=8)
    B, F = 2, 40                     # frame_length 40 -> seg_length 8

    root = jax.random.PRNGKey(0)
    k_rgb, k_aud, k_par = jax.random.split(root, 3)
    rgb = jax.random.normal(k_rgb, (B, F, cfg["rgb_feature_size"]), jnp.float32)
    audio = jax.random.normal(k_aud, (B, F, cfg["audio_feature_size"]), jnp.float32)
    params = init_params(k_par, cfg)

    outs = jax.block_until_ready(gru_model_forward(rgb, audio, params, cfg))
    vid_probs, attn_idc, scores, attn_weights, conv_loss = outs

    r_probs, r_idc, r_scores, r_attn, r_loss, r_logits = reference_forward(
        rgb, audio, params, cfg)

    S = F // 5
    assert vid_probs.shape == (B, cfg["num_classes"])
    assert attn_idc.shape == (B, cfg["num_classes"])
    assert scores.shape == (B, S, cfg["n_attns"])
    assert attn_weights.shape == (B, S, cfg["n_attns"])

    tol = dict(atol=1e-3, rtol=1e-3)
    assert jnp.allclose(vid_probs, r_probs, **tol), "vid_probs mismatch"
    assert jnp.allclose(scores, r_scores, **tol), "scores mismatch"
    assert jnp.allclose(attn_weights, r_attn, **tol), "attn_weights mismatch"
    assert jnp.allclose(conv_loss, r_loss, **tol), "conv_loss mismatch"

    # argmax over heads must match wherever the reference's top-2 head logits are
    # not numerically tied (guards against ulp-level op-reordering flips only).
    if not bool(jnp.array_equal(attn_idc, r_idc)):
        srt = jnp.sort(r_logits, axis=-1)
        gap = srt[..., -1] - srt[..., -2]
        assert bool(jnp.all((attn_idc == r_idc) | (gap < 1e-4))), "attn_idc mismatch"

    print("KERNEL_OK")
</pallas_src>

<mosaic_0001>
module attributes {stable_mosaic.version = 11 : i64} {
  func.func @gru_model_kernel(%arg0: memref<80x40xf32, #tpu.memory_space<vmem>>, %arg1: memref<16x16xf32, #tpu.memory_space<vmem>>, %arg2: memref<40x32xf32, #tpu.memory_space<vmem>>, %arg3: memref<1x32xf32, #tpu.memory_space<vmem>>, %arg4: memref<32x96xf32, #tpu.memory_space<vmem>>, %arg5: memref<1x96xf32, #tpu.memory_space<vmem>>, %arg6: memref<32x96xf32, #tpu.memory_space<vmem>>, %arg7: memref<1x96xf32, #tpu.memory_space<vmem>>, %arg8: memref<256x768xf32, #tpu.memory_space<vmem>>, %arg9: memref<1x768xf32, #tpu.memory_space<vmem>>, %arg10: memref<512x32xf32, #tpu.memory_space<vmem>>, %arg11: memref<8x128xf32, #tpu.memory_space<vmem>>, %arg12: memref<128x16xf32, #tpu.memory_space<vmem>>, %arg13: memref<16x8xf32, #tpu.memory_space<vmem>>, %arg14: memref<1x8xf32, #tpu.memory_space<vmem>>, %arg15: memref<1x8xf32, #tpu.memory_space<vmem>>, %arg16: memref<1x8xf32, #tpu.memory_space<vmem>>, %arg17: memref<8x128xf32, #tpu.memory_space<vmem>>) attributes {dimension_semantics = [], scalar_prefetch = 0 : i64, scratch_operands = 0 : i64, tpu.core_type = #tpu.core_type<tc>} {
    %c0 = arith.constant 0 : index
    %c0_0 = arith.constant 0 : index
    %0 = tpu.strided_load %arg0[%c0, %c0_0] {strides = array<i32: 5, 1>} : memref<80x40xf32, #tpu.memory_space<vmem>>, vector<8x40xf32>
    %c1 = arith.constant 1 : index
    %c0_1 = arith.constant 0 : index
    %1 = tpu.strided_load %arg0[%c1, %c0_1] {strides = array<i32: 5, 1>} : memref<80x40xf32, #tpu.memory_space<vmem>>, vector<8x40xf32>
    %2 = arith.addf %0, %1 : vector<8x40xf32>
    %c2 = arith.constant 2 : index
    %c0_2 = arith.constant 0 : index
    %3 = tpu.strided_load %arg0[%c2, %c0_2] {strides = array<i32: 5, 1>} : memref<80x40xf32, #tpu.memory_space<vmem>>, vector<8x40xf32>
    %4 = arith.addf %2, %3 : vector<8x40xf32>
    %c3 = arith.constant 3 : index
    %c0_3 = arith.constant 0 : index
    %5 = tpu.strided_load %arg0[%c3, %c0_3] {strides = array<i32: 5, 1>} : memref<80x40xf32, #tpu.memory_space<vmem>>, vector<8x40xf32>
    %6 = arith.addf %4, %5 : vector<8x40xf32>
    %c4 = arith.constant 4 : index
    %c0_4 = arith.constant 0 : index
    %7 = tpu.strided_load %arg0[%c4, %c0_4] {strides = array<i32: 5, 1>} : memref<80x40xf32, #tpu.memory_space<vmem>>, vector<8x40xf32>
    %8 = arith.addf %6, %7 : vector<8x40xf32>
    %c40 = arith.constant 40 : index
    %c0_5 = arith.constant 0 : index
    %9 = tpu.strided_load %arg0[%c40, %c0_5] {strides = array<i32: 5, 1>} : memref<80x40xf32, #tpu.memory_space<vmem>>, vector<8x40xf32>
    %c41 = arith.constant 41 : index
    %c0_6 = arith.constant 0 : index
    %10 = tpu.strided_load %arg0[%c41, %c0_6] {strides = array<i32: 5, 1>} : memref<80x40xf32, #tpu.memory_space<vmem>>, vector<8x40xf32>
    %11 = arith.addf %9, %10 : vector<8x40xf32>
    %c42 = arith.constant 42 : index
    %c0_7 = arith.constant 0 : index
    %12 = tpu.strided_load %arg0[%c42, %c0_7] {strides = array<i32: 5, 1>} : memref<80x40xf32, #tpu.memory_space<vmem>>, vector<8x40xf32>
    %13 = arith.addf %11, %12 : vector<8x40xf32>
    %c43 = arith.constant 43 : index
    %c0_8 = arith.constant 0 : index
    %14 = tpu.strided_load %arg0[%c43, %c0_8] {strides = array<i32: 5, 1>} : memref<80x40xf32, #tpu.memory_space<vmem>>, vector<8x40xf32>
    %15 = arith.addf %13, %14 : vector<8x40xf32>
    %c44 = arith.constant 44 : index
    %c0_9 = arith.constant 0 : index
    %16 = tpu.strided_load %arg0[%c44, %c0_9] {strides = array<i32: 5, 1>} : memref<80x40xf32, #tpu.memory_space<vmem>>, vector<8x40xf32>
    %17 = arith.addf %15, %16 : vector<8x40xf32>
    %18 = tpu.concatenate %8, %17 in 0 : vector<8x40xf32>, vector<8x40xf32> -> vector<16x40xf32>
    %c0_10 = arith.constant 0 : index
    %c0_11 = arith.constant 0 : index
    %19 = vector.load %arg1[%c0_10, %c0_11] : memref<16x16xf32, #tpu.memory_space<vmem>>, vector<16x16xf32>
    %cst = arith.constant dense<0.000000e+00> : vector<16x40xf32>
    %20 = tpu.matmul %19, %18, %cst {dimension_numbers = #tpu.dot_dimension_numbers<[1], [0], [0], [1], [0, 0, 1, 1], [], []>} : vector<16x16xf32>, vector<16x40xf32>, vector<16x40xf32> -> vector<16x40xf32>
    %c0_12 = arith.constant 0 : index
    %c0_13 = arith.constant 0 : index
    %21 = vector.load %arg2[%c0_12, %c0_13] : memref<40x32xf32, #tpu.memory_space<vmem>>, vector<40x32xf32>
    %cst_14 = arith.constant dense<0.000000e+00> : vector<16x32xf32>
    %22 = tpu.matmul %20, %21, %cst_14 {dimension_numbers = #tpu.dot_dimension_numbers<[1], [0], [0], [1], [0, 0, 1, 1], [], []>} : vector<16x40xf32>, vector<40x32xf32>, vector<16x32xf32> -> vector<16x32xf32>
    %c0_15 = arith.constant 0 : index
    %c0_16 = arith.constant 0 : index
    %23 = vector.load %arg3[%c0_15, %c0_16] : memref<1x32xf32, #tpu.memory_space<vmem>>, vector<1x32xf32>
    %24 = vector.broadcast %23 : vector<1x32xf32> to vector<16x32xf32>
    %25 = arith.addf %22, %24 : vector<16x32xf32>
    %cst_17 = arith.constant 0.000000e+00 : f32
    %26 = vector.broadcast %cst_17 : f32 to vector<16x32xf32>
    %27 = arith.maximumf %25, %26 : vector<16x32xf32>
    %c0_18 = arith.constant 0 : index
    %c0_19 = arith.constant 0 : index
    %28 = vector.load %arg4[%c0_18, %c0_19] : memref<32x96xf32, #tpu.memory_space<vmem>>, vector<32x96xf32>
    %cst_20 = arith.constant dense<0.000000e+00> : vector<16x96xf32>
    %29 = tpu.matmul %27, %28, %cst_20 {dimension_numbers = #tpu.dot_dimension_numbers<[1], [0], [0], [1], [0, 0, 1, 1], [], []>} : vector<16x32xf32>, vector<32x96xf32>, vector<16x96xf32> -> vector<16x96xf32>
    %c0_21 = arith.constant 0 : index
    %c0_22 = arith.constant 0 : index
    %30 = vector.load %arg5[%c0_21, %c0_22] : memref<1x96xf32, #tpu.memory_space<vmem>>, vector<1x96xf32>
    %31 = vector.broadcast %30 : vector<1x96xf32> to vector<16x96xf32>
    %32 = arith.addf %29, %31 : vector<16x96xf32>
    %c0_23 = arith.constant 0 : index
    %c0_24 = arith.constant 0 : index
    %33 = vector.load %arg6[%c0_23, %c0_24] : memref<32x96xf32, #tpu.memory_space<vmem>>, vector<32x96xf32>
    %c0_25 = arith.constant 0 : index
    %c0_26 = arith.constant 0 : index
    %34 = vector.load %arg7[%c0_25, %c0_26] : memref<1x96xf32, #tpu.memory_space<vmem>>, vector<1x96xf32>
    %cst_27 = arith.constant 0.000000e+00 : f32
    %35 = vector.broadcast %cst_27 : f32 to vector<2x32xf32>
    %36 = vector.extract_strided_slice %32 {offsets = [0, 0], sizes = [2, 96], strides = [1, 1]} : vector<16x96xf32> to vector<2x96xf32>
    %cst_28 = arith.constant dense<0.000000e+00> : vector<2x96xf32>
    %37 = tpu.matmul %35, %33, %cst_28 {dimension_numbers = #tpu.dot_dimension_numbers<[1], [0], [0], [1], [0, 0, 1, 1], [], []>} : vector<2x32xf32>, vector<32x96xf32>, vector<2x96xf32> -> vector<2x96xf32>
    %38 = vector.broadcast %34 : vector<1x96xf32> to vector<2x96xf32>
    %39 = arith.addf %37, %38 : vector<2x96xf32>
    %40 = vector.extract_strided_slice %36 {offsets = [0, 0], sizes = [2, 32], strides = [1, 1]} : vector<2x96xf32> to vector<2x32xf32>
    %41 = vector.extract_strided_slice %39 {offsets = [0, 0], sizes = [2, 32], strides = [1, 1]} : vector<2x96xf32> to vector<2x32xf32>
    %42 = arith.addf %40, %41 : vector<2x32xf32>
    %cst_29 = arith.constant 5.000000e-01 : f32
    %43 = vector.broadcast %cst_29 : f32 to vector<2x32xf32>
    %44 = arith.mulf %43, %42 : vector<2x32xf32>
    %45 = math.tanh %44 : vector<2x32xf32>
    %cst_30 = arith.constant 1.000000e+00 : f32
    %46 = vector.broadcast %cst_30 : f32 to vector<2x32xf32>
    %47 = arith.addf %45, %46 : vector<2x32xf32>
    %cst_31 = arith.constant 5.000000e-01 : f32
    %48 = vector.broadcast %cst_31 : f32 to vector<2x32xf32>
    %49 = arith.mulf %48, %47 : vector<2x32xf32>
    %50 = vector.extract_strided_slice %36 {offsets = [0, 32], sizes = [2, 32], strides = [1, 1]} : vector<2x96xf32> to vector<2x32xf32>
    %51 = vector.extract_strided_slice %39 {offsets = [0, 32], sizes = [2, 32], strides = [1, 1]} : vector<2x96xf32> to vector<2x32xf32>
    %52 = arith.addf %50, %51 : vector<2x32xf32>
    %cst_32 = arith.constant 5.000000e-01 : f32
    %53 = vector.broadcast %cst_32 : f32 to vector<2x32xf32>
    %54 = arith.mulf %53, %52 : vector<2x32xf32>
    %55 = math.tanh %54 : vector<2x32xf32>
    %cst_33 = arith.constant 1.000000e+00 : f32
    %56 = vector.broadcast %cst_33 : f32 to vector<2x32xf32>
    %57 = arith.addf %55, %56 : vector<2x32xf32>
    %cst_34 = arith.constant 5.000000e-01 : f32
    %58 = vector.broadcast %cst_34 : f32 to vector<2x32xf32>
    %59 = arith.mulf %58, %57 : vector<2x32xf32>
    %60 = vector.extract_strided_slice %36 {offsets = [0, 64], sizes = [2, 32], strides = [1, 1]} : vector<2x96xf32> to vector<2x32xf32>
    %61 = vector.extract_strided_slice %39 {offsets = [0, 64], sizes = [2, 32], strides = [1, 1]} : vector<2x96xf32> to vector<2x32xf32>
    %62 = arith.mulf %49, %61 : vector<2x32xf32>
    %63 = arith.addf %60, %62 : vector<2x32xf32>
    %64 = math.tanh %63 : vector<2x32xf32>
    %65 = arith.subf %35, %64 : vector<2x32xf32>
    %66 = arith.mulf %59, %65 : vector<2x32xf32>
    %67 = arith.addf %64, %66 : vector<2x32xf32>
    %68 = vector.extract_strided_slice %32 {offsets = [2, 0], sizes = [2, 96], strides = [1, 1]} : vector<16x96xf32> to vector<2x96xf32>
    %cst_35 = arith.constant dense<0.000000e+00> : vector<2x96xf32>
    %69 = tpu.matmul %67, %33, %cst_35 {dimension_numbers = #tpu.dot_dimension_numbers<[1], [0], [0], [1], [0, 0, 1, 1], [], []>} : vector<2x32xf32>, vector<32x96xf32>, vector<2x96xf32> -> vector<2x96xf32>
    %70 = vector.broadcast %34 : vector<1x96xf32> to vector<2x96xf32>
    %71 = arith.addf %69, %70 : vector<2x96xf32>
    %72 = vector.extract_strided_slice %68 {offsets = [0, 0], sizes = [2, 32], strides = [1, 1]} : vector<2x96xf32> to vector<2x32xf32>
    %73 = vector.extract_strided_slice %71 {offsets = [0, 0], sizes = [2, 32], strides = [1, 1]} : vector<2x96xf32> to vector<2x32xf32>
    %74 = arith.addf %72, %73 : vector<2x32xf32>
    %cst_36 = arith.constant 5.000000e-01 : f32
    %75 = vector.broadcast %cst_36 : f32 to vector<2x32xf32>
    %76 = arith.mulf %75, %74 : vector<2x32xf32>
    %77 = math.tanh %76 : vector<2x32xf32>
    %cst_37 = arith.constant 1.000000e+00 : f32
    %78 = vector.broadcast %cst_37 : f32 to vector<2x32xf32>
    %79 = arith.addf %77, %78 : vector<2x32xf32>
    %cst_38 = arith.constant 5.000000e-01 : f32
    %80 = vector.broadcast %cst_38 : f32 to vector<2x32xf32>
    %81 = arith.mulf %80, %79 : vector<2x32xf32>
    %82 = vector.extract_strided_slice %68 {offsets = [0, 32], sizes = [2, 32], strides = [1, 1]} : vector<2x96xf32> to vector<2x32xf32>
    %83 = vector.extract_strided_slice %71 {offsets = [0, 32], sizes = [2, 32], strides = [1, 1]} : vector<2x96xf32> to vector<2x32xf32>
    %84 = arith.addf %82, %83 : vector<2x32xf32>
    %cst_39 = arith.constant 5.000000e-01 : f32
    %85 = vector.broadcast %cst_39 : f32 to vector<2x32xf32>
    %86 = arith.mulf %85, %84 : vector<2x32xf32>
    %87 = math.tanh %86 : vector<2x32xf32>
    %cst_40 = arith.constant 1.000000e+00 : f32
    %88 = vector.broadcast %cst_40 : f32 to vector<2x32xf32>
    %89 = arith.addf %87, %88 : vector<2x32xf32>
    %cst_41 = arith.constant 5.000000e-01 : f32
    %90 = vector.broadcast %cst_41 : f32 to vector<2x32xf32>
    %91 = arith.mulf %90, %89 : vector<2x32xf32>
    %92 = vector.extract_strided_slice %68 {offsets = [0, 64], sizes = [2, 32], strides = [1, 1]} : vector<2x96xf32> to vector<2x32xf32>
    %93 = vector.extract_strided_slice %71 {offsets = [0, 64], sizes = [2, 32], strides = [1, 1]} : vector<2x96xf32> to vector<2x32xf32>
    %94 = arith.mulf %81, %93 : vector<2x32xf32>
    %95 = arith.addf %92, %94 : vector<2x32xf32>
    %96 = math.tanh %95 : vector<2x32xf32>
    %97 = arith.subf %67, %96 : vector<2x32xf32>
    %98 = arith.mulf %91, %97 : vector<2x32xf32>
    %99 = arith.addf %96, %98 : vector<2x32xf32>
    %100 = vector.extract_strided_slice %32 {offsets = [4, 0], sizes = [2, 96], strides = [1, 1]} : vector<16x96xf32> to vector<2x96xf32>
    %cst_42 = arith.constant dense<0.000000e+00> : vector<2x96xf32>
    %101 = tpu.matmul %99, %33, %cst_42 {dimension_numbers = #tpu.dot_dimension_numbers<[1], [0], [0], [1], [0, 0, 1, 1], [], []>} : vector<2x32xf32>, vector<32x96xf32>, vector<2x96xf32> -> vector<2x96xf32>
    %102 = vector.broadcast %34 : vector<1x96xf32> to vector<2x96xf32>
    %103 = arith.addf %101, %102 : vector<2x96xf32>
    %104 = vector.extract_strided_slice %100 {offsets = [0, 0], sizes = [2, 32], strides = [1, 1]} : vector<2x96xf32> to vector<2x32xf32>
    %105 = vector.extract_strided_slice %103 {offsets = [0, 0], sizes = [2, 32], strides = [1, 1]} : vector<2x96xf32> to vector<2x32xf32>
    %106 = arith.addf %104, %105 : vector<2x32xf32>
    %cst_43 = arith.constant 5.000000e-01 : f32
    %107 = vector.broadcast %cst_43 : f32 to vector<2x32xf32>
    %108 = arith.mulf %107, %106 : vector<2x32xf32>
    %109 = math.tanh %108 : vector<2x32xf32>
    %cst_44 = arith.constant 1.000000e+00 : f32
    %110 = vector.broadcast %cst_44 : f32 to vector<2x32xf32>
    %111 = arith.addf %109, %110 : vector<2x32xf32>
    %cst_45 = arith.constant 5.000000e-01 : f32
    %112 = vector.broadcast %cst_45 : f32 to vector<2x32xf32>
    %113 = arith.mulf %112, %111 : vector<2x32xf32>
    %114 = vector.extract_strided_slice %100 {offsets = [0, 32], sizes = [2, 32], strides = [1, 1]} : vector<2x96xf32> to vector<2x32xf32>
    %115 = vector.extract_strided_slice %103 {offsets = [0, 32], sizes = [2, 32], strides = [1, 1]} : vector<2x96xf32> to vector<2x32xf32>
    %116 = arith.addf %114, %115 : vector<2x32xf32>
    %cst_46 = arith.constant 5.000000e-01 : f32
    %117 = vector.broadcast %cst_46 : f32 to vector<2x32xf32>
    %118 = arith.mulf %117, %116 : vector<2x32xf32>
    %119 = math.tanh %118 : vector<2x32xf32>
    %cst_47 = arith.constant 1.000000e+00 : f32
    %120 = vector.broadcast %cst_47 : f32 to vector<2x32xf32>
    %121 = arith.addf %119, %120 : vector<2x32xf32>
    %cst_48 = arith.constant 5.000000e-01 : f32
    %122 = vector.broadcast %cst_48 : f32 to vector<2x32xf32>
    %123 = arith.mulf %122, %121 : vector<2x32xf32>
    %124 = vector.extract_strided_slice %100 {offsets = [0, 64], sizes = [2, 32], strides = [1, 1]} : vector<2x96xf32> to vector<2x32xf32>
    %125 = vector.extract_strided_slice %103 {offsets = [0, 64], sizes = [2, 32], strides = [1, 1]} : vector<2x96xf32> to vector<2x32xf32>
    %126 = arith.mulf %113, %125 : vector<2x32xf32>
    %127 = arith.addf %124, %126 : vector<2x32xf32>
    %128 = math.tanh %127 : vector<2x32xf32>
    %129 = arith.subf %99, %128 : vector<2x32xf32>
    %130 = arith.mulf %123, %129 : vector<2x32xf32>
    %131 = arith.addf %128, %130 : vector<2x32xf32>
    %132 = vector.extract_strided_slice %32 {offsets = [6, 0], sizes = [2, 96], strides = [1, 1]} : vector<16x96xf32> to vector<2x96xf32>
    %cst_49 = arith.constant dense<0.000000e+00> : vector<2x96xf32>
    %133 = tpu.matmul %131, %33, %cst_49 {dimension_numbers = #tpu.dot_dimension_numbers<[1], [0], [0], [1], [0, 0, 1, 1], [], []>} : vector<2x32xf32>, vector<32x96xf32>, vector<2x96xf32> -> vector<2x96xf32>
    %134 = vector.broadcast %34 : vector<1x96xf32> to vector<2x96xf32>
    %135 = arith.addf %133, %134 : vector<2x96xf32>
    %136 = vector.extract_strided_slice %132 {offsets = [0, 0], sizes = [2, 32], strides = [1, 1]} : vector<2x96xf32> to vector<2x32xf32>
    %137 = vector.extract_strided_slice %135 {offsets = [0, 0], sizes = [2, 32], strides = [1, 1]} : vector<2x96xf32> to vector<2x32xf32>
    %138 = arith.addf %136, %137 : vector<2x32xf32>
    %cst_50 = arith.constant 5.000000e-01 : f32
    %139 = vector.broadcast %cst_50 : f32 to vector<2x32xf32>
    %140 = arith.mulf %139, %138 : vector<2x32xf32>
    %141 = math.tanh %140 : vector<2x32xf32>
    %cst_51 = arith.constant 1.000000e+00 : f32
    %142 = vector.broadcast %cst_51 : f32 to vector<2x32xf32>
    %143 = arith.addf %141, %142 : vector<2x32xf32>
    %cst_52 = arith.constant 5.000000e-01 : f32
    %144 = vector.broadcast %cst_52 : f32 to vector<2x32xf32>
    %145 = arith.mulf %144, %143 : vector<2x32xf32>
    %146 = vector.extract_strided_slice %132 {offsets = [0, 32], sizes = [2, 32], strides = [1, 1]} : vector<2x96xf32> to vector<2x32xf32>
    %147 = vector.extract_strided_slice %135 {offsets = [0, 32], sizes = [2, 32], strides = [1, 1]} : vector<2x96xf32> to vector<2x32xf32>
    %148 = arith.addf %146, %147 : vector<2x32xf32>
    %cst_53 = arith.constant 5.000000e-01 : f32
    %149 = vector.broadcast %cst_53 : f32 to vector<2x32xf32>
    %150 = arith.mulf %149, %148 : vector<2x32xf32>
    %151 = math.tanh %150 : vector<2x32xf32>
    %cst_54 = arith.constant 1.000000e+00 : f32
    %152 = vector.broadcast %cst_54 : f32 to vector<2x32xf32>
    %153 = arith.addf %151, %152 : vector<2x32xf32>
    %cst_55 = arith.constant 5.000000e-01 : f32
    %154 = vector.broadcast %cst_55 : f32 to vector<2x32xf32>
    %155 = arith.mulf %154, %153 : vector<2x32xf32>
    %156 = vector.extract_strided_slice %132 {offsets = [0, 64], sizes = [2, 32], strides = [1, 1]} : vector<2x96xf32> to vector<2x32xf32>
    %157 = vector.extract_strided_slice %135 {offsets = [0, 64], sizes = [2, 32], strides = [1, 1]} : vector<2x96xf32> to vector<2x32xf32>
    %158 = arith.mulf %145, %157 : vector<2x32xf32>
    %159 = arith.addf %156, %158 : vector<2x32xf32>
    %160 = math.tanh %159 : vector<2x32xf32>
    %161 = arith.subf %131, %160 : vector<2x32xf32>
    %162 = arith.mulf %155, %161 : vector<2x32xf32>
    %163 = arith.addf %160, %162 : vector<2x32xf32>
    %164 = vector.extract_strided_slice %32 {offsets = [8, 0], sizes = [2, 96], strides = [1, 1]} : vector<16x96xf32> to vector<2x96xf32>
    %cst_56 = arith.constant dense<0.000000e+00> : vector<2x96xf32>
    %165 = tpu.matmul %163, %33, %cst_56 {dimension_numbers = #tpu.dot_dimension_numbers<[1], [0], [0], [1], [0, 0, 1, 1], [], []>} : vector<2x32xf32>, vector<32x96xf32>, vector<2x96xf32> -> vector<2x96xf32>
    %166 = vector.broadcast %34 : vector<1x96xf32> to vector<2x96xf32>
    %167 = arith.addf %165, %166 : vector<2x96xf32>
    %168 = vector.extract_strided_slice %164 {offsets = [0, 0], sizes = [2, 32], strides = [1, 1]} : vector<2x96xf32> to vector<2x32xf32>
    %169 = vector.extract_strided_slice %167 {offsets = [0, 0], sizes = [2, 32], strides = [1, 1]} : vector<2x96xf32> to vector<2x32xf32>
    %170 = arith.addf %168, %169 : vector<2x32xf32>
    %cst_57 = arith.constant 5.000000e-01 : f32
    %171 = vector.broadcast %cst_57 : f32 to vector<2x32xf32>
    %172 = arith.mulf %171, %170 : vector<2x32xf32>
    %173 = math.tanh %172 : vector<2x32xf32>
    %cst_58 = arith.constant 1.000000e+00 : f32
    %174 = vector.broadcast %cst_58 : f32 to vector<2x32xf32>
    %175 = arith.addf %173, %174 : vector<2x32xf32>
    %cst_59 = arith.constant 5.000000e-01 : f32
    %176 = vector.broadcast %cst_59 : f32 to vector<2x32xf32>
    %177 = arith.mulf %176, %175 : vector<2x32xf32>
    %178 = vector.extract_strided_slice %164 {offsets = [0, 32], sizes = [2, 32], strides = [1, 1]} : vector<2x96xf32> to vector<2x32xf32>
    %179 = vector.extract_strided_slice %167 {offsets = [0, 32], sizes = [2, 32], strides = [1, 1]} : vector<2x96xf32> to vector<2x32xf32>
    %180 = arith.addf %178, %179 : vector<2x32xf32>
    %cst_60 = arith.constant 5.000000e-01 : f32
    %181 = vector.broadcast %cst_60 : f32 to vector<2x32xf32>
    %182 = arith.mulf %181, %180 : vector<2x32xf32>
    %183 = math.tanh %182 : vector<2x32xf32>
    %cst_61 = arith.constant 1.000000e+00 : f32
    %184 = vector.broadcast %cst_61 : f32 to vector<2x32xf32>
    %185 = arith.addf %183, %184 : vector<2x32xf32>
    %cst_62 = arith.constant 5.000000e-01 : f32
    %186 = vector.broadcast %cst_62 : f32 to vector<2x32xf32>
    %187 = arith.mulf %186, %185 : vector<2x32xf32>
    %188 = vector.extract_strided_slice %164 {offsets = [0, 64], sizes = [2, 32], strides = [1, 1]} : vector<2x96xf32> to vector<2x32xf32>
    %189 = vector.extract_strided_slice %167 {offsets = [0, 64], sizes = [2, 32], strides = [1, 1]} : vector<2x96xf32> to vector<2x32xf32>
    %190 = arith.mulf %177, %189 : vector<2x32xf32>
    %191 = arith.addf %188, %190 : vector<2x32xf32>
    %192 = math.tanh %191 : vector<2x32xf32>
    %193 = arith.subf %163, %192 : vector<2x32xf32>
    %194 = arith.mulf %187, %193 : vector<2x32xf32>
    %195 = arith.addf %192, %194 : vector<2x32xf32>
    %196 = vector.extract_strided_slice %32 {offsets = [10, 0], sizes = [2, 96], strides = [1, 1]} : vector<16x96xf32> to vector<2x96xf32>
    %cst_63 = arith.constant dense<0.000000e+00> : vector<2x96xf32>
    %197 = tpu.matmul %195, %33, %cst_63 {dimension_numbers = #tpu.dot_dimension_numbers<[1], [0], [0], [1], [0, 0, 1, 1], [], []>} : vector<2x32xf32>, vector<32x96xf32>, vector<2x96xf32> -> vector<2x96xf32>
    %198 = vector.broadcast %34 : vector<1x96xf32> to vector<2x96xf32>
    %199 = arith.addf %197, %198 : vector<2x96xf32>
    %200 = vector.extract_strided_slice %196 {offsets = [0, 0], sizes = [2, 32], strides = [1, 1]} : vector<2x96xf32> to vector<2x32xf32>
    %201 = vector.extract_strided_slice %199 {offsets = [0, 0], sizes = [2, 32], strides = [1, 1]} : vector<2x96xf32> to vector<2x32xf32>
    %202 = arith.addf %200, %201 : vector<2x32xf32>
    %cst_64 = arith.constant 5.000000e-01 : f32
    %203 = vector.broadcast %cst_64 : f32 to vector<2x32xf32>
    %204 = arith.mulf %203, %202 : vector<2x32xf32>
    %205 = math.tanh %204 : vector<2x32xf32>
    %cst_65 = arith.constant 1.000000e+00 : f32
    %206 = vector.broadcast %cst_65 : f32 to vector<2x32xf32>
    %207 = arith.addf %205, %206 : vector<2x32xf32>
    %cst_66 = arith.constant 5.000000e-01 : f32
    %208 = vector.broadcast %cst_66 : f32 to vector<2x32xf32>
    %209 = arith.mulf %208, %207 : vector<2x32xf32>
    %210 = vector.extract_strided_slice %196 {offsets = [0, 32], sizes = [2, 32], strides = [1, 1]} : vector<2x96xf32> to vector<2x32xf32>
    %211 = vector.extract_strided_slice %199 {offsets = [0, 32], sizes = [2, 32], strides = [1, 1]} : vector<2x96xf32> to vector<2x32xf32>
    %212 = arith.addf %210, %211 : vector<2x32xf32>
    %cst_67 = arith.constant 5.000000e-01 : f32
    %213 = vector.broadcast %cst_67 : f32 to vector<2x32xf32>
    %214 = arith.mulf %213, %212 : vector<2x32xf32>
    %215 = math.tanh %214 : vector<2x32xf32>
    %cst_68 = arith.constant 1.000000e+00 : f32
    %216 = vector.broadcast %cst_68 : f32 to vector<2x32xf32>
    %217 = arith.addf %215, %216 : vector<2x32xf32>
    %cst_69 = arith.constant 5.000000e-01 : f32
    %218 = vector.broadcast %cst_69 : f32 to vector<2x32xf32>
    %219 = arith.mulf %218, %217 : vector<2x32xf32>
    %220 = vector.extract_strided_slice %196 {offsets = [0, 64], sizes = [2, 32], strides = [1, 1]} : vector<2x96xf32> to vector<2x32xf32>
    %221 = vector.extract_strided_slice %199 {offsets = [0, 64], sizes = [2, 32], strides = [1, 1]} : vector<2x96xf32> to vector<2x32xf32>
    %222 = arith.mulf %209, %221 : vector<2x32xf32>
    %223 = arith.addf %220, %222 : vector<2x32xf32>
    %224 = math.tanh %223 : vector<2x32xf32>
    %225 = arith.subf %195, %224 : vector<2x32xf32>
    %226 = arith.mulf %219, %225 : vector<2x32xf32>
    %227 = arith.addf %224, %226 : vector<2x32xf32>
    %228 = vector.extract_strided_slice %32 {offsets = [12, 0], sizes = [2, 96], strides = [1, 1]} : vector<16x96xf32> to vector<2x96xf32>
    %cst_70 = arith.constant dense<0.000000e+00> : vector<2x96xf32>
    %229 = tpu.matmul %227, %33, %cst_70 {dimension_numbers = #tpu.dot_dimension_numbers<[1], [0], [0], [1], [0, 0, 1, 1], [], []>} : vector<2x32xf32>, vector<32x96xf32>, vector<2x96xf32> -> vector<2x96xf32>
    %230 = vector.broadcast %34 : vector<1x96xf32> to vector<2x96xf32>
    %231 = arith.addf %229, %230 : vector<2x96xf32>
    %232 = vector.extract_strided_slice %228 {offsets = [0, 0], sizes = [2, 32], strides = [1, 1]} : vector<2x96xf32> to vector<2x32xf32>
    %233 = vector.extract_strided_slice %231 {offsets = [0, 0], sizes = [2, 32], strides = [1, 1]} : vector<2x96xf32> to vector<2x32xf32>
    %234 = arith.addf %232, %233 : vector<2x32xf32>
    %cst_71 = arith.constant 5.000000e-01 : f32
    %235 = vector.broadcast %cst_71 : f32 to vector<2x32xf32>
    %236 = arith.mulf %235, %234 : vector<2x32xf32>
    %237 = math.tanh %236 : vector<2x32xf32>
    %cst_72 = arith.constant 1.000000e+00 : f32
    %238 = vector.broadcast %cst_72 : f32 to vector<2x32xf32>
    %239 = arith.addf %237, %238 : vector<2x32xf32>
    %cst_73 = arith.constant 5.000000e-01 : f32
    %240 = vector.broadcast %cst_73 : f32 to vector<2x32xf32>
    %241 = arith.mulf %240, %239 : vector<2x32xf32>
    %242 = vector.extract_strided_slice %228 {offsets = [0, 32], sizes = [2, 32], strides = [1, 1]} : vector<2x96xf32> to vector<2x32xf32>
    %243 = vector.extract_strided_slice %231 {offsets = [0, 32], sizes = [2, 32], strides = [1, 1]} : vector<2x96xf32> to vector<2x32xf32>
    %244 = arith.addf %242, %243 : vector<2x32xf32>
    %cst_74 = arith.constant 5.000000e-01 : f32
    %245 = vector.broadcast %cst_74 : f32 to vector<2x32xf32>
    %246 = arith.mulf %245, %244 : vector<2x32xf32>
    %247 = math.tanh %246 : vector<2x32xf32>
    %cst_75 = arith.constant 1.000000e+00 : f32
    %248 = vector.broadcast %cst_75 : f32 to vector<2x32xf32>
    %249 = arith.addf %247, %248 : vector<2x32xf32>
    %cst_76 = arith.constant 5.000000e-01 : f32
    %250 = vector.broadcast %cst_76 : f32 to vector<2x32xf32>
    %251 = arith.mulf %250, %249 : vector<2x32xf32>
    %252 = vector.extract_strided_slice %228 {offsets = [0, 64], sizes = [2, 32], strides = [1, 1]} : vector<2x96xf32> to vector<2x32xf32>
    %253 = vector.extract_strided_slice %231 {offsets = [0, 64], sizes = [2, 32], strides = [1, 1]} : vector<2x96xf32> to vector<2x32xf32>
    %254 = arith.mulf %241, %253 : vector<2x32xf32>
    %255 = arith.addf %252, %254 : vector<2x32xf32>
    %256 = math.tanh %255 : vector<2x32xf32>
    %257 = arith.subf %227, %256 : vector<2x32xf32>
    %258 = arith.mulf %251, %257 : vector<2x32xf32>
    %259 = arith.addf %256, %258 : vector<2x32xf32>
    %260 = vector.extract_strided_slice %32 {offsets = [14, 0], sizes = [2, 96], strides = [1, 1]} : vector<16x96xf32> to vector<2x96xf32>
    %cst_77 = arith.constant dense<0.000000e+00> : vector<2x96xf32>
    %261 = tpu.matmul %259, %33, %cst_77 {dimension_numbers = #tpu.dot_dimension_numbers<[1], [0], [0], [1], [0, 0, 1, 1], [], []>} : vector<2x32xf32>, vector<32x96xf32>, vector<2x96xf32> -> vector<2x96xf32>
    %262 = vector.broadcast %34 : vector<1x96xf32> to vector<2x96xf32>
    %263 = arith.addf %261, %262 : vector<2x96xf32>
    %264 = vector.extract_strided_slice %260 {offsets = [0, 0], sizes = [2, 32], strides = [1, 1]} : vector<2x96xf32> to vector<2x32xf32>
    %265 = vector.extract_strided_slice %263 {offsets = [0, 0], sizes = [2, 32], strides = [1, 1]} : vector<2x96xf32> to vector<2x32xf32>
    %266 = arith.addf %264, %265 : vector<2x32xf32>
    %cst_78 = arith.constant 5.000000e-01 : f32
    %267 = vector.broadcast %cst_78 : f32 to vector<2x32xf32>
    %268 = arith.mulf %267, %266 : vector<2x32xf32>
    %269 = math.tanh %268 : vector<2x32xf32>
    %cst_79 = arith.constant 1.000000e+00 : f32
    %270 = vector.broadcast %cst_79 : f32 to vector<2x32xf32>
    %271 = arith.addf %269, %270 : vector<2x32xf32>
    %cst_80 = arith.constant 5.000000e-01 : f32
    %272 = vector.broadcast %cst_80 : f32 to vector<2x32xf32>
    %273 = arith.mulf %272, %271 : vector<2x32xf32>
    %274 = vector.extract_strided_slice %260 {offsets = [0, 32], sizes = [2, 32], strides = [1, 1]} : vector<2x96xf32> to vector<2x32xf32>
    %275 = vector.extract_strided_slice %263 {offsets = [0, 32], sizes = [2, 32], strides = [1, 1]} : vector<2x96xf32> to vector<2x32xf32>
    %276 = arith.addf %274, %275 : vector<2x32xf32>
    %cst_81 = arith.constant 5.000000e-01 : f32
    %277 = vector.broadcast %cst_81 : f32 to vector<2x32xf32>
    %278 = arith.mulf %277, %276 : vector<2x32xf32>
    %279 = math.tanh %278 : vector<2x32xf32>
    %cst_82 = arith.constant 1.000000e+00 : f32
    %280 = vector.broadcast %cst_82 : f32 to vector<2x32xf32>
    %281 = arith.addf %279, %280 : vector<2x32xf32>
    %cst_83 = arith.constant 5.000000e-01 : f32
    %282 = vector.broadcast %cst_83 : f32 to vector<2x32xf32>
    %283 = arith.mulf %282, %281 : vector<2x32xf32>
    %284 = vector.extract_strided_slice %260 {offsets = [0, 64], sizes = [2, 32], strides = [1, 1]} : vector<2x96xf32> to vector<2x32xf32>
    %285 = vector.extract_strided_slice %263 {offsets = [0, 64], sizes = [2, 32], strides = [1, 1]} : vector<2x96xf32> to vector<2x32xf32>
    %286 = arith.mulf %273, %285 : vector<2x32xf32>
    %287 = arith.addf %284, %286 : vector<2x32xf32>
    %288 = math.tanh %287 : vector<2x32xf32>
    %289 = arith.subf %259, %288 : vector<2x32xf32>
    %290 = arith.mulf %283, %289 : vector<2x32xf32>
    %291 = arith.addf %288, %290 : vector<2x32xf32>
    %292 = tpu.concatenate %67, %99, %131, %163, %195, %227, %259, %291 in 1 : vector<2x32xf32>, vector<2x32xf32>, vector<2x32xf32>, vector<2x32xf32>, vector<2x32xf32>, vector<2x32xf32>, vector<2x32xf32>, vector<2x32xf32> -> vector<2x256xf32>
    %c0_84 = arith.constant 0 : index
    %c0_85 = arith.constant 0 : index
    %293 = vector.load %arg8[%c0_84, %c0_85] : memref<256x768xf32, #tpu.memory_space<vmem>>, vector<256x768xf32>
    %cst_86 = arith.constant dense<0.000000e+00> : vector<2x768xf32>
    %294 = tpu.matmul %292, %293, %cst_86 {dimension_numbers = #tpu.dot_dimension_numbers<[1], [0], [0], [1], [0, 0, 1, 1], [], []>} : vector<2x256xf32>, vector<256x768xf32>, vector<2x768xf32> -> vector<2x768xf32>
    %c0_87 = arith.constant 0 : index
    %c0_88 = arith.constant 0 : index
    %295 = vector.load %arg9[%c0_87, %c0_88] : memref<1x768xf32, #tpu.memory_space<vmem>>, vector<1x768xf32>
    %296 = vector.broadcast %295 : vector<1x768xf32> to vector<2x768xf32>
    %297 = arith.addf %294, %296 : vector<2x768xf32>
    %298 = vector.extract_strided_slice %297 {offsets = [0, 0], sizes = [2, 128], strides = [1, 1]} : vector<2x768xf32> to vector<2x128xf32>
    %299 = vector.extract_strided_slice %297 {offsets = [0, 128], sizes = [2, 128], strides = [1, 1]} : vector<2x768xf32> to vector<2x128xf32>
    %300 = vector.extract_strided_slice %297 {offsets = [0, 256], sizes = [2, 512], strides = [1, 1]} : vector<2x768xf32> to vector<2x512xf32>
    %301 = tpu.concatenate %298, %298, %298, %298 in 1 : vector<2x128xf32>, vector<2x128xf32>, vector<2x128xf32>, vector<2x128xf32> -> vector<2x512xf32>
    %302 = arith.mulf %300, %301 : vector<2x512xf32>
    %c0_89 = arith.constant 0 : index
    %c0_90 = arith.constant 0 : index
    %303 = vector.load %arg10[%c0_89, %c0_90] : memref<512x32xf32, #tpu.memory_space<vmem>>, vector<512x32xf32>
    %cst_91 = arith.constant dense<0.000000e+00> : vector<2x32xf32>
    %304 = tpu.matmul %302, %303, %cst_91 {dimension_numbers = #tpu.dot_dimension_numbers<[1], [0], [0], [1], [0, 0, 1, 1], [], []>} : vector<2x512xf32>, vector<512x32xf32>, vector<2x32xf32> -> vector<2x32xf32>
    %305 = vector.extract_strided_slice %304 {offsets = [0, 0], sizes = [2, 8], strides = [1, 1]} : vector<2x32xf32> to vector<2x8xf32>
    %306 = vector.extract_strided_slice %304 {offsets = [0, 8], sizes = [2, 8], strides = [1, 1]} : vector<2x32xf32> to vector<2x8xf32>
    %307 = vector.extract_strided_slice %304 {offsets = [0, 16], sizes = [2, 8], strides = [1, 1]} : vector<2x32xf32> to vector<2x8xf32>
    %308 = vector.extract_strided_slice %304 {offsets = [0, 24], sizes = [2, 8], strides = [1, 1]} : vector<2x32xf32> to vector<2x8xf32>
    %309 = tpu.concatenate %305, %306, %307, %308 in 0 : vector<2x8xf32>, vector<2x8xf32>, vector<2x8xf32>, vector<2x8xf32> -> vector<8x8xf32>
    %cst_92 = arith.constant dense<0xFF800000> : vector<8xf32>
    %310 = vector.multi_reduction <maximumf>, %309, %cst_92 [1] : vector<8x8xf32> to vector<8xf32>
    %311 = vector.shape_cast %310 : vector<8xf32> to vector<8x1xf32>
    %312 = vector.broadcast %311 : vector<8x1xf32> to vector<8x8xf32>
    %313 = arith.subf %309, %312 : vector<8x8xf32>
    %314 = math.exp %313 : vector<8x8xf32>
    %cst_93 = arith.constant dense<0.000000e+00> : vector<8xf32>
    %315 = vector.multi_reduction <add>, %314, %cst_93 [1] : vector<8x8xf32> to vector<8xf32>
    %316 = vector.shape_cast %315 : vector<8xf32> to vector<8x1xf32>
    %317 = vector.broadcast %316 : vector<8x1xf32> to vector<8x8xf32>
    %318 = arith.divf %314, %317 : vector<8x8xf32>
    %c0_94 = arith.constant 0 : index
    %c0_95 = arith.constant 0 : index
    %319 = vector.load %arg11[%c0_94, %c0_95] : memref<8x128xf32, #tpu.memory_space<vmem>>, vector<8x128xf32>
    %cst_96 = arith.constant dense<0.000000e+00> : vector<8x128xf32>
    %320 = tpu.matmul %318, %319, %cst_96 {dimension_numbers = #tpu.dot_dimension_numbers<[1], [0], [0], [1], [0, 0, 1, 1], [], []>} : vector<8x8xf32>, vector<8x128xf32>, vector<8x128xf32> -> vector<8x128xf32>
    %321 = tpu.concatenate %299, %299, %299, %299 in 0 : vector<2x128xf32>, vector<2x128xf32>, vector<2x128xf32>, vector<2x128xf32> -> vector<8x128xf32>
    %322 = arith.mulf %320, %321 : vector<8x128xf32>
    %c0_97 = arith.constant 0 : index
    %c0_98 = arith.constant 0 : index
    %323 = vector.load %arg12[%c0_97, %c0_98] : memref<128x16xf32, #tpu.memory_space<vmem>>, vector<128x16xf32>
    %cst_99 = arith.constant dense<0.000000e+00> : vector<8x16xf32>
    %324 = tpu.matmul %322, %323, %cst_99 {dimension_numbers = #tpu.dot_dimension_numbers<[1], [0], [0], [1], [0, 0, 1, 1], [], []>} : vector<8x128xf32>, vector<128x16xf32>, vector<8x16xf32> -> vector<8x16xf32>
    %cst_100 = arith.constant 0.000000e+00 : f32
    %325 = vector.broadcast %cst_100 : f32 to vector<8x16xf32>
    %326 = arith.maximumf %324, %325 : vector<8x16xf32>
    %c0_101 = arith.constant 0 : index
    %c0_102 = arith.constant 0 : index
    %327 = vector.load %arg13[%c0_101, %c0_102] : memref<16x8xf32, #tpu.memory_space<vmem>>, vector<16x8xf32>
    %cst_103 = arith.constant dense<0.000000e+00> : vector<8x8xf32>
    %328 = tpu.matmul %326, %327, %cst_103 {dimension_numbers = #tpu.dot_dimension_numbers<[1], [0], [0], [1], [0, 0, 1, 1], [], []>} : vector<8x16xf32>, vector<16x8xf32>, vector<8x8xf32> -> vector<8x8xf32>
    %c0_104 = arith.constant 0 : index
    %c0_105 = arith.constant 0 : index
    %329 = vector.load %arg14[%c0_104, %c0_105] : memref<1x8xf32, #tpu.memory_space<vmem>>, vector<1x8xf32>
    %330 = vector.broadcast %329 : vector<1x8xf32> to vector<8x8xf32>
    %331 = arith.addf %328, %330 : vector<8x8xf32>
    %cst_106 = arith.constant dense<0.000000e+00> : vector<8xf32>
    %332 = vector.multi_reduction <add>, %331, %cst_106 [1] : vector<8x8xf32> to vector<8xf32>
    %333 = vector.shape_cast %332 : vector<8xf32> to vector<8x1xf32>
    %cst_107 = arith.constant 8.000000e+00 : f32
    %334 = vector.broadcast %cst_107 : f32 to vector<8x1xf32>
    %335 = arith.divf %333, %334 : vector<8x1xf32>
    %336 = vector.broadcast %335 : vector<8x1xf32> to vector<8x8xf32>
    %337 = arith.subf %331, %336 : vector<8x8xf32>
    %338 = arith.mulf %337, %337 : vector<8x8xf32>
    %cst_108 = arith.constant dense<0.000000e+00> : vector<8xf32>
    %339 = vector.multi_reduction <add>, %338, %cst_108 [1] : vector<8x8xf32> to vector<8xf32>
    %340 = vector.shape_cast %339 : vector<8xf32> to vector<8x1xf32>
    %cst_109 = arith.constant 7.000000e+00 : f32
    %341 = vector.broadcast %cst_109 : f32 to vector<8x1xf32>
    %342 = arith.divf %340, %341 : vector<8x1xf32>
    %343 = math.sqrt %342 : vector<8x1xf32>
    %c0_110 = arith.constant 0 : index
    %c0_111 = arith.constant 0 : index
    %344 = vector.load %arg15[%c0_110, %c0_111] : memref<1x8xf32, #tpu.memory_space<vmem>>, vector<1x8xf32>
    %345 = vector.broadcast %335 : vector<8x1xf32> to vector<8x8xf32>
    %346 = arith.subf %331, %345 : vector<8x8xf32>
    %347 = vector.broadcast %344 : vector<1x8xf32> to vector<8x8xf32>
    %348 = arith.mulf %347, %346 : vector<8x8xf32>
    %cst_112 = arith.constant 9.99999997E-7 : f32
    %349 = vector.broadcast %cst_112 : f32 to vector<8x1xf32>
    %350 = arith.addf %343, %349 : vector<8x1xf32>
    %351 = tpu.reciprocal %350 : vector<8x1xf32> -> vector<8x1xf32>
    %352 = vector.broadcast %351 : vector<8x1xf32> to vector<8x8xf32>
    %353 = arith.mulf %348, %352 : vector<8x8xf32>
    %c0_113 = arith.constant 0 : index
    %c0_114 = arith.constant 0 : index
    %354 = vector.load %arg16[%c0_113, %c0_114] : memref<1x8xf32, #tpu.memory_space<vmem>>, vector<1x8xf32>
    %355 = vector.broadcast %354 : vector<1x8xf32> to vector<8x8xf32>
    %356 = arith.addf %353, %355 : vector<8x8xf32>
    %357 = vector.extract_strided_slice %356 {offsets = [0, 0], sizes = [2, 8], strides = [1, 1]} : vector<8x8xf32> to vector<2x8xf32>
    %cst_115 = arith.constant 0.000000e+00 : f32
    %358 = vector.broadcast %cst_115 : f32 to vector<2x8xf32>
    %359 = vector.extract_strided_slice %356 {offsets = [2, 0], sizes = [2, 8], strides = [1, 1]} : vector<8x8xf32> to vector<2x8xf32>
    %360 = arith.cmpf ogt, %359, %357 : vector<2x8xf32>
    %cst_116 = arith.constant 1.000000e+00 : f32
    %361 = vector.broadcast %cst_116 : f32 to vector<2x8xf32>
    %362 = arith.select %360, %361, %358 : vector<2x8xi1>, vector<2x8xf32>
    %363 = arith.select %360, %359, %357 : vector<2x8xi1>, vector<2x8xf32>
    %364 = vector.extract_strided_slice %356 {offsets = [4, 0], sizes = [2, 8], strides = [1, 1]} : vector<8x8xf32> to vector<2x8xf32>
    %365 = arith.cmpf ogt, %364, %363 : vector<2x8xf32>
    %cst_117 = arith.constant 2.000000e+00 : f32
    %366 = vector.broadcast %cst_117 : f32 to vector<2x8xf32>
    %367 = arith.select %365, %366, %362 : vector<2x8xi1>, vector<2x8xf32>
    %368 = arith.select %365, %364, %363 : vector<2x8xi1>, vector<2x8xf32>
    %369 = vector.extract_strided_slice %356 {offsets = [6, 0], sizes = [2, 8], strides = [1, 1]} : vector<8x8xf32> to vector<2x8xf32>
    %370 = arith.cmpf ogt, %369, %368 : vector<2x8xf32>
    %cst_118 = arith.constant 3.000000e+00 : f32
    %371 = vector.broadcast %cst_118 : f32 to vector<2x8xf32>
    %372 = arith.select %370, %371, %367 : vector<2x8xi1>, vector<2x8xf32>
    %373 = arith.select %370, %369, %368 : vector<2x8xi1>, vector<2x8xf32>
    %cst_119 = arith.constant 5.000000e-01 : f32
    %374 = vector.broadcast %cst_119 : f32 to vector<2x8xf32>
    %375 = arith.mulf %374, %373 : vector<2x8xf32>
    %376 = math.tanh %375 : vector<2x8xf32>
    %cst_120 = arith.constant 1.000000e+00 : f32
    %377 = vector.broadcast %cst_120 : f32 to vector<2x8xf32>
    %378 = arith.addf %376, %377 : vector<2x8xf32>
    %cst_121 = arith.constant 5.000000e-01 : f32
    %379 = vector.broadcast %cst_121 : f32 to vector<2x8xf32>
    %380 = arith.mulf %379, %378 : vector<2x8xf32>
    %cst_122 = arith.constant 0.000000e+00 : f32
    %381 = vector.broadcast %cst_122 : f32 to vector<6x8xf32>
    %cst_123 = arith.constant 0.000000e+00 : f32
    %382 = vector.broadcast %cst_123 : f32 to vector<8x96xf32>
    %383 = tpu.concatenate %380, %381 in 0 : vector<2x8xf32>, vector<6x8xf32> -> vector<8x8xf32>
    %384 = tpu.concatenate %372, %381 in 0 : vector<2x8xf32>, vector<6x8xf32> -> vector<8x8xf32>
    %385 = tpu.concatenate %309, %318, %383, %384, %382 in 1 : vector<8x8xf32>, vector<8x8xf32>, vector<8x8xf32>, vector<8x8xf32>, vector<8x96xf32> -> vector<8x128xf32>
    %c0_124 = arith.constant 0 : index
    %c0_125 = arith.constant 0 : index
    %386 = vector.load %arg17[%c0_124, %c0_125] : memref<8x128xf32, #tpu.memory_space<vmem>>, vector<8x128xf32>
    tpu.vector_store %arg17[%c0_124, %c0_125], %385 {strides = array<i32>} : memref<8x128xf32, #tpu.memory_space<vmem>>, vector<8x128xf32>,
    return
  }
}

</mosaic_0001>

<bundles_post_ra>
// kernel: tpu_custom_call.1
= control target key start
LH: loop header
LB: loop body
LE: loop exit
PB: predicated region body
PF: predicated region fallthrough
CT: control target
= control target key end

     0   :  { %s3840_s0 = inlined_call_operand.vmem [shape: f32[80,40], index: 0, kind: input, shape index: {}]   ;;  %s3841_s1 = inlined_call_operand.vmem [shape: f32[16,16], index: 1, kind: input, shape index: {}]   ;;  %s3842_s2 = inlined_call_operand.vmem [shape: f32[40,32], index: 2, kind: input, shape index: {}]   ;;  %s3843_s3 = inlined_call_operand.vmem [shape: f32[1,32], index: 3, kind: input, shape index: {}]   ;;  %s3844_s4 = inlined_call_operand.vmem [shape: f32[32,96], index: 4, kind: input, shape index: {}]   ;;  %s3845_s5 = inlined_call_operand.vmem [shape: f32[1,96], index: 5, kind: input, shape index: {}]   ;;  %s3846_s6 = inlined_call_operand.vmem [shape: f32[32,96], index: 6, kind: input, shape index: {}]   ;;  %s3847_s7 = inlined_call_operand.vmem [shape: f32[1,96], index: 7, kind: input, shape index: {}]   ;;  %s3848_s8 = inlined_call_operand.hbm [shape: f32[256,768], index: 8, kind: input, shape index: {}]   ;;  %s3849_s9 = inlined_call_operand.vmem [shape: f32[1,768], index: 9, kind: input, shape index: {}]   ;;  %s3850_s10 = inlined_call_operand.vmem [shape: f32[512,32], index: 10, kind: input, shape index: {}]   ;;  %s3851_s11 = inlined_call_operand.vmem [shape: f32[8,128], index: 11, kind: input, shape index: {}]   ;;  %s3852_s12 = inlined_call_operand.vmem [shape: f32[128,16], index: 12, kind: input, shape index: {}]   ;;  %s3853_s13 = inlined_call_operand.vmem [shape: f32[16,8], index: 13, kind: input, shape index: {}]   ;;  %s3854_s14 = inlined_call_operand.vmem [shape: f32[1,8], index: 14, kind: input, shape index: {}]   ;;  %s3855_s15 = inlined_call_operand.vmem [shape: f32[1,8], index: 15, kind: input, shape index: {}]   ;;  %s3856_s16 = inlined_call_operand.vmem [shape: f32[1,8], index: 16, kind: input, shape index: {}]   ;;  %s3857_s17 = inlined_call_operand.hbm [shape: f32[8,128], index: 17, kind: output, shape index: {}]  }
   0x1   :  { %3860 = sst [smem:[#allocation8_spill]] %s3840_s0 }
   0x2   :  { %3861 = sst [smem:[#allocation9_spill]] %s3841_s1 }
   0x3   :  { %22 = vsyncpa [#allocation3], 0 }
   0x4   :  { %23 = vsyncpa [#allocation4], 0  ;;  %s3115_s24 = smov [#allocation2]   ;;  %s3067_s28 = scalar_lea.hbm %s3848_s8, 24576 }
   0x5   :  { %s45_s25 = sshll.u32 %s3115_s24, 4  ;;  %p3068_p0 = scmp.ne.s32.totalorder %s3848_s8, %s3067_s28  ;;  %s46_s25 = int_to_ptr.vmem [resolvable:$true] %s45_s25 }
   0x6   :  { %p3071_p1 = scmp.lt.u32.totalorder %s3067_s28, %s3848_s8 }
   0x8   :  { %p3073_p2 = pnand %p3071_p1, %p3068_p0 }
   0xa   :  { %3076 = shalt.err (!%p3073_p2)
}
   0xb   :  { %s3077_s19 = scalar_lea.vmem %s46_s25, 24576  ;;  %p3082_p4 = scmp.lt.s32.totalorder %s46_s25, %s46_s25 }
   0xc   :  { %p3078_p3 = scmp.ne.s32.totalorder %s46_s25, %s3077_s19  ;;  %p3083_p5 = scmp.lt.s32.totalorder %s3077_s19, %s3077_s19 }
   0xe   :  { %p3084_p6 = por %p3083_p5, %p3082_p4 }
  0x10   :  { %p3085_p7 = pnand %p3084_p6, %p3078_p3 }
  0x12   :  { %3088 = shalt.err (!%p3085_p7)
}
  0x13   :  { %s3116_s1 = smov 768   ;;  %s3117_s20 = smov 48  }
  0x14   :  { %51 = dma.hbm_to_vmem [thread:$0]  %s3848_s8, 24576, %s46_s25, [#allocation3], %s3116_s1, %s3116_s1, %s3117_s20  }
  0x15   :  { %3111 = dma.done.wait [#allocation3], 24576  }
  0x16   :  { %3112 = vsyncadd [#allocation3], 4294942720  ;;  %s3862_s26 = sld [smem:[#allocation8_spill]]  ;;  %vm100_vm0 = vcmask 130048   ;;  %s3863_s24 = sld [smem:[#allocation9_spill]]  ;;  %v182_v18 = vld [vmem:[%s3842_s2] sm:$0xff] }
  0x17   :  { %v183_v19 = vld [vmem:[%s3842_s2 + $0x8] sm:$0xff]  ;;  %v184_v23 = vld [vmem:[%s3842_s2 + $0x10] sm:$0xff]  ;;  %v185_v24 = vld [vmem:[%s3842_s2 + $0x18] sm:$0xff]  ;;  %vm194_vm1 = vcmask 326656   ;;  %v3118_v39 = vmov 0.0|0.0   ;;  %vm3119_vm2 = vmmov 0  }
  0x18   :  { %v2652_v22 = vpack.c.bf16 %v183_v19, %v182_v18  ;;  %v2656_v26 = vpack.c.bf16 %v185_v24, %v184_v23  ;;  %v186_v27 = vld [vmem:[%s3842_s2 + $0x20] sm:$0xff]  ;;  %v279_v29 = vld [vmem:[%s3844_s4 + $0x8] sm:$0xff]  ;;  %v280_v33 = vld [vmem:[%s3844_s4 + $0x10] sm:$0xff]  ;;  %2674 = vmatprep.subr.bf16.mxu0 %v3118_v39  ;;  %v3120_v43 = vmov 0.0   ;;  %vm289_vm3 = vcmask 261120   ;;  %s3121_s18 = smov 64  }
  0x19   :  { %v278_v28 = vld [vmem:[%s3844_s4] sm:$0xff]  ;;  %v281_v34 = vld [vmem:[%s3844_s4 + $0x18] sm:$0xff]  ;;  %v372_v37 = vld [vmem:[%s3846_s6 + $0x8] sm:$0xff]  ;;  %2532 = vmatprep.mubr.msk.f32.mxu0 %vm3119_vm2, %v3120_v43  ;;  %vm1260_vm4 = vcmask 523264   ;;  %vm1262_vm5 = vcmask 785408   ;;  %s3125_s0 = smov 120  }
  0x1a   :  { %v2660_v30 = vpack.c.bf16 %v279_v29, %v278_v28  ;;  %v2664_v35 = vpack.c.bf16 %v281_v34, %v280_v33  ;;  %v371_v36 = vld [vmem:[%s3846_s6] sm:$0xff]  ;;  %v373_v40 = vld [vmem:[%s3846_s6 + $0x10] sm:$0xff]  ;;  %v374_v41 = vld [vmem:[%s3846_s6 + $0x18] sm:$0xff]  ;;  %s3126_s30 = smov 104   ;;  %vm1925_vm6 = vcmask 1041408   ;;  %vm1927_vm7 = vcmask 1043456  }
  0x1b   :  { %v3304_v38 = vpack.c.bf16 %v372_v37, %v371_v36  ;;  %v3316_v42 = vpack.c.bf16 %v374_v41, %v373_v40  ;;  %v2314_v44 = vld [vmem:[%s3843_s3] ss:$0 sm:$0xff]  ;;  %vm1931_vm8 = vcmask 64512   ;;  %vm1929_vm9 = vcmask 1045504   ;;  %s3130_s27 = smov [#allocation5]  }
  0x1c   :  { %v71_v0 = vld [vmem:[%s3862_s26] ss:$5 sm:$0xff]  ;;  %v2303_v1 = vld [vmem:[%s3862_s26 + $0x1] ss:$5 sm:$0xff]  ;;  %v2308_v6 = vld [vmem:[%s3862_s26 + $0x29] ss:$5 sm:$0xff] }
  0x1d   :  { %v2304_v2 = vld [vmem:[%s3862_s26 + $0x2] ss:$5 sm:$0xff]  ;;  %v74_v3 = vadd.f32 %v2303_v1, %v71_v0  ;;  %v2307_v4 = vld [vmem:[%s3862_s26 + $0x28] ss:$5 sm:$0xff]  ;;  %2676 = vmatpush3.bf16.msra.mxu0 %v3304_v38  ;;  %vm2284_vm15 = vcmask 195584   ;;  %s2294_s28 = sshll.u32 %s3130_s27, 4  ;;  %s2295_s28 = int_to_ptr.vmem [resolvable:$true] %s2294_s28 }
  0x1e   :  { %v2305_v5 = vld [vmem:[%s3862_s26 + $0x3] ss:$5 sm:$0xff]  ;;  %v88_v9 = vadd.f32 %v2308_v6, %v2307_v4  ;;  %v2306_v11 = vld [vmem:[%s3862_s26 + $0x4] ss:$5 sm:$0xff]  ;;  %v2311_v15 = vld [vmem:[%s3862_s26 + $0x2c] ss:$5 sm:$0xff]  ;;  %2677 = vmatprep.subr.bf16.mxu0 %v3118_v39  ;;  %p3094_p9 = scmp.lt.s32.totalorder %s2295_s28, %s2295_s28 }
  0x1f   :  { %v2309_v7 = vld [vmem:[%s3862_s26 + $0x2a] ss:$5 sm:$0xff]  ;;  %v77_v8 = vadd.f32 %v2304_v2, %v74_v3  ;;  %v2310_v12 = vld [vmem:[%s3862_s26 + $0x2b] ss:$5 sm:$0xff]  ;;  %v2317_v51 = vld [vmem:[%s3845_s5] ss:$0 sm:$0xff] }
  0x20   :  { %v98_v10 = vld [vmem:[%s3863_s24] sm:$0xff]  ;;  %v91_v14 = vadd.f32 %v2309_v7, %v88_v9  ;;  %v99_v25 = vld [vmem:[%s3863_s24 + $0x8] sm:$0xff]  ;;  %s3122_s5 = smov 96   ;;  %s3089_s29 = scalar_lea.vmem %s2295_s28, 128 }
  0x21   :  { %2486 = vmatprep.mubr.msk.f32.mxu1 %vm100_vm0, %v98_v10  ;;  %v80_v13 = vadd.f32 %v2305_v5, %v77_v8  ;;  %2679 = vmatpush3.bf16.msra.mxu0 %v3316_v42  ;;  %v3348_v55 = vld [vmem:[%s3847_s7] ss:$0 sm:$0xff]  ;;  %s3123_s7 = smov 32   ;;  %p3090_p8 = scmp.ne.s32.totalorder %s2295_s28, %s3089_s29 }
  0x22   :  { %v94_v17 = vadd.f32 %v2310_v12, %v91_v14  ;;  %2686 = vmatprep.subr.bf16.mxu0 %v3118_v39  ;;  %p3095_p10 = scmp.lt.s32.totalorder %s3089_s29, %s3089_s29 }
  0x23   :  { %v83_v16 = vadd.f32 %v2306_v11, %v80_v13 }
  0x24   :  { %v97_v20 = vadd.f32 %v2311_v15, %v94_v17  ;;  %p3096_p11 = por %p3095_p10, %p3094_p9 }
  0x26   :  { %v2648_v21 = vpack.c.bf16 %v97_v20, %v83_v16  ;;  %p3097_p12 = pnand %p3096_p11, %p3090_p8 }
  0x28   :  { %2649 = vmatprep.subr.bf16.mxu1 %v2648_v21 }
  0x29   :  { %2651 = vmatpush3.bf16.msra.mxu1 %v2648_v21 }
  0x2a   :  { %2653 = vmatprep.subr.bf16.mxu1 %v2652_v22 }
  0x2c   :  { %2487 = vmatmul.mubr.msk.f32.vlgmr.msra.gmra.mrb[0].mxu1 %vm100_vm0, %v99_v25 }
  0x2d   :  { %2655 = vmatpush3.bf16.msra.mxu1 %v2652_v22 }
  0x2e   :  { %2657 = vmatprep.subr.bf16.mxu1 %v2656_v26 }
  0x31   :  { %2659 = vmatpush3.bf16.msra.mxu1 %v2656_v26 }
  0x32   :  { %2497 = vmatprep.subr.mxu1 %v186_v27 }
  0x35   :  { %2498 = vmatpush3.msra.mxu1 %v186_v27 }
  0x36   :  { %2661 = vmatprep.subr.bf16.mxu1 %v2660_v30 }
  0xff   :  { %v2488_v31 = vpop.f32.mrb[0].mxu1 }
 0x100   :  { %v173_v32 = vpop.f32.mrb[1].mxu1 }
 0x101   :  { %2499 = vmatprep.mubr.msk.f32.mxu1 %vm194_vm1, %v173_v32 }
 0x102   :  { %2500 = vmatmul.mubr.msk.f32.vlgmr.msra.gmra.mrb[2].mxu1 %vm194_vm1, %v2488_v31 }
 0x103   :  { %2663 = vmatpush3.bf16.msra.mxu1 %v2660_v30 }
 0x104   :  { %2665 = vmatprep.subr.bf16.mxu1 %v2664_v35 }
 0x107   :  { %2667 = vmatpush3.bf16.msra.mxu1 %v2664_v35 }
 0x108   :  { %2668 = vmatprep.subr.bf16.mxu1 %v3118_v39 }
 0x1d5   :  { %v2501_v45 = vpop.f32.mrb[2].mxu1 }
 0x1d6   :  { %v273_v46 = vadd.f32 %v2501_v45, %v2314_v44  ;;  %v267_v47 = vpop.f32.mrb[3].mxu1 }
 0x1d7   :  { %v268_v48 = vadd.f32 %v2314_v44, %v267_v47 }
 0x1d8   :  { %v277_v50 = vmax.f32 %v273_v46, 0.0 }
 0x1d9   :  { %v276_v49 = vmax.f32 %v268_v48, 0.0 }
 0x1db   :  { %2510 = vmatprep.mubr.msk.f32.mxu1 %vm289_vm3, %v276_v49 }
 0x1dc   :  { %2511 = vmatmul.mubr.msk.f32.vlgmr.msra.gmra.mrb[4].mxu1 %vm289_vm3, %v277_v50 }
 0x1dd   :  { %2670 = vmatpush3.bf16.msra.mxu1 %v3304_v38  ;;  %2521 = vmatprep.mubr.msk.f32.mxu1 %vm3119_vm2, %v3120_v43 }
 0x1de   :  { %2671 = vmatprep.subr.bf16.mxu1 %v3118_v39 }
 0x1e1   :  { %2673 = vmatpush3.bf16.msra.mxu1 %v3316_v42 }
 0x1e2   :  { %2680 = vmatprep.subr.bf16.mxu1 %v3118_v39 }
 0x1e4   :  { %2522 = vmatmul.mubr.f32.vlgmr.msra.gmra.mrb[6].mxu1 %v3120_v43 }
 0x1e5   :  { %2682 = vmatpush3.bf16.msra.mxu1 %v3304_v38  ;;  %2543 = vmatprep.mubr.msk.f32.mxu1 %vm3119_vm2, %v3120_v43 }
 0x1e6   :  { %2683 = vmatprep.subr.bf16.mxu1 %v3118_v39 }
 0x1e9   :  { %2685 = vmatpush3.bf16.msra.mxu1 %v3316_v42 }
 0x1ea   :  { %2692 = vmatprep.subr.bf16.mxu1 %v3118_v39 }
 0x2af   :  { %v2512_v52 = vpop.f32.mrb[4].mxu1 }
 0x2b0   :  { %v3343_v53 = vadd.f32 %v2512_v52, %v2317_v51  ;;  %v362_v54 = vpop.f32.mrb[5].mxu1 }
 0x2b1   :  { %v3352_v59 = vadd.f32 %v2317_v51, %v362_v54 }
 0x2b7   :  { %v451_v56 = vpop.f32.mrb[6].mxu1 }
 0x2b8   :  { %v452_v57 = vadd.f32 %v3348_v55, %v451_v56  ;;  %v2523_v58 = vpop.f32.mrb[7].mxu1 }
 0x2ba   :  { %461 = vrot.lane.b32.xlu0 %v452_v57, %s3121_s18  ;;  %v455_v60 = vadd.f32 %v452_v57, %v3352_v59 }
 0x2bc   :  { %v456_v61 = vmul.f32 0.5, %v455_v60 }
 0x2be   :  { %3025 = vtanh.f32 %v456_v61 }
 0x2c8   :  { %v3026_v62 = vpop.eup %3025 }
 0x2c9   :  { %v458_v63 = vadd.f32 1.0, %v3026_v62 }
 0x2cb   :  { %v459_v0 = vmul.f32 0.5, %v458_v63 }
 0x32c   :  { %v462_v1 = vpop.permute.xlu0 %461 }
 0x32d   :  { %v464_v2 = vmul.f32 %v462_v1, %v459_v0 }
 0x32f   :  { %466 = vrot.lane.b32.xlu0 %v464_v2, %s3121_s18 }
 0x3a1   :  { %v467_v3 = vpop.permute.xlu0 %466 }
 0x3a2   :  { %v469_v4 = vadd.f32 %v467_v3, %v3352_v59 }
 0x3a4   :  { %3027 = vtanh.f32 %v469_v4 }
 0x3ae   :  { %v3028_v5 = vpop.eup %3027 }
 0x3af   :  { %v471_v6 = vsub.f32 0.0, %v3028_v5 }
 0x3b1   :  { %473 = vrot.lane.b32.xlu1 %v471_v6, %s3122_s5 }
 0x423   :  { %v474_v7 = vpop.permute.xlu1 %473 }
 0x424   :  { %v476_v8 = vmul.f32 %v474_v7, %v459_v0 }
 0x426   :  { %478 = vrot.lane.b32.xlu1 %v476_v8, %s3123_s7 }
 0x498   :  { %v479_v9 = vpop.permute.xlu1 %478 }
 0x499   :  { %v481_v10 = vadd.f32 %v3028_v5, %v479_v9 }
 0x49b   :  { %483 = vrot.lane.b32.xlu0 %v481_v10, %s3121_s18 }
 0x50d   :  { %v3360_v11 = vpop.permute.xlu0 %483 }
 0x50e   :  { %2533 = vmatmul.mubr.msk.f32.vlgmr.msra.gmra.mrb[0].mxu0 %vm289_vm3, %v3360_v11 }
 0x50f   :  { %2688 = vmatpush3.bf16.msra.mxu0 %v3304_v38  ;;  %2554 = vmatprep.mubr.msk.f32.mxu0 %vm3119_vm2, %v3120_v43 }
 0x510   :  { %2689 = vmatprep.subr.bf16.mxu0 %v3118_v39 }
 0x513   :  { %2691 = vmatpush3.bf16.msra.mxu0 %v3316_v42 }
 0x514   :  { %2698 = vmatprep.subr.bf16.mxu0 %v3118_v39 }
 0x5e1   :  { %v553_v12 = vpop.f32.mrb[0].mxu0 }
 0x5e2   :  { %v554_v13 = vadd.f32 %v3348_v55, %v553_v12  ;;  %v2534_v14 = vpop.f32.mrb[1].mxu0 }
 0x5e4   :  { %v558_v15 = vrot.slane %v554_v13, 6 }
 0x5e6   :  { %565 = vrot.lane.b32.xlu1 %v558_v15, %s3121_s18  ;;  %v560_v16 = vadd.f32 %v558_v15, %v3352_v59 }
 0x5e8   :  { %v561_v17 = vmul.f32 0.5, %v560_v16 }
 0x5ea   :  { %3029 = vtanh.f32 %v561_v17 }
 0x5f4   :  { %v3030_v18 = vpop.eup %3029 }
 0x5f5   :  { %v563_v19 = vadd.f32 1.0, %v3030_v18 }
 0x5f7   :  { %v564_v20 = vmul.f32 0.5, %v563_v19 }
 0x658   :  { %v566_v21 = vpop.permute.xlu1 %565 }
 0x659   :  { %v568_v22 = vmul.f32 %v566_v21, %v564_v20 }
 0x65b   :  { %570 = vrot.lane.b32.xlu0 %v568_v22, %s3121_s18 }
 0x6cd   :  { %v571_v23 = vpop.permute.xlu0 %570 }
 0x6ce   :  { %v573_v24 = vadd.f32 %v571_v23, %v3352_v59 }
 0x6d0   :  { %3031 = vtanh.f32 %v573_v24 }
 0x6da   :  { %v3032_v25 = vpop.eup %3031 }
 0x6db   :  { %v576_v26 = vrot.slane %v3032_v25, 2 }
 0x6dd   :  { %v578_v27 = vsub.f32 %v481_v10, %v576_v26 }
 0x6df   :  { %v580_v28 = vrot.slane %v578_v27, 6 }
 0x6e1   :  { %581 = vrot.lane.b32.xlu1 %v580_v28, %s3122_s5 }
 0x753   :  { %v582_v29 = vpop.permute.xlu1 %581 }
 0x754   :  { %v584_v30 = vmul.f32 %v582_v29, %v564_v20 }
 0x756   :  { %586 = vrot.lane.b32.xlu0 %v584_v30, %s3123_s7 }
 0x7c8   :  { %v587_v31 = vpop.permute.xlu0 %586 }
 0x7c9   :  { %v3377_v32 = vadd.f32 %v3032_v25, %v587_v31 }
 0x7cb   :  { %v591_v33 = vrot.slane %v3377_v32, 2 }
 0x7cd   :  { %592 = vrot.lane.b32.xlu1 %v591_v33, %s3121_s18 }
 0x83f   :  { %v593_v34 = vpop.permute.xlu1 %592 }
 0x840   :  { %2544 = vmatmul.mubr.msk.f32.vlgmr.msra.gmra.mrb[8].mxu1 %vm289_vm3, %v593_v34 }
 0x841   :  { %2694 = vmatpush3.bf16.msra.mxu1 %v3304_v38  ;;  %2565 = vmatprep.mubr.msk.f32.mxu1 %vm3119_vm2, %v3120_v43 }
 0x842   :  { %2695 = vmatprep.subr.bf16.mxu1 %v3118_v39 }
 0x845   :  { %2697 = vmatpush3.bf16.msra.mxu1 %v3316_v42 }
 0x846   :  { %2704 = vmatprep.subr.bf16.mxu1 %v3118_v39 }
 0x913   :  { %v662_v35 = vpop.f32.mrb[8].mxu1 }
 0x914   :  { %v663_v36 = vadd.f32 %v3348_v55, %v662_v35  ;;  %v2545_v37 = vpop.f32.mrb[9].mxu1 }
 0x916   :  { %v667_v40 = vrot.slane %v663_v36, 4 }
 0x918   :  { %674 = vrot.lane.b32.xlu0 %v667_v40, %s3121_s18  ;;  %v669_v41 = vadd.f32 %v667_v40, %v3352_v59 }
 0x91a   :  { %v670_v44 = vmul.f32 0.5, %v669_v41 }
 0x91c   :  { %3033 = vtanh.f32 %v670_v44 }
 0x926   :  { %v3034_v45 = vpop.eup %3033 }
 0x927   :  { %v672_v46 = vadd.f32 1.0, %v3034_v45 }
 0x929   :  { %v673_v47 = vmul.f32 0.5, %v672_v46 }
 0x98a   :  { %v675_v48 = vpop.permute.xlu0 %674 }
 0x98b   :  { %v677_v49 = vmul.f32 %v675_v48, %v673_v47 }
 0x98d   :  { %679 = vrot.lane.b32.xlu1 %v677_v49, %s3121_s18 }
 0x9ff   :  { %v680_v50 = vpop.permute.xlu1 %679 }
 0xa00   :  { %v682_v51 = vadd.f32 %v680_v50, %v3352_v59 }
 0xa02   :  { %3035 = vtanh.f32 %v682_v51 }
 0xa0c   :  { %v3036_v52 = vpop.eup %3035 }
 0xa0d   :  { %v685_v54 = vrot.slane %v3036_v52, 2 }
 0xa0f   :  { %v687_v56 = vsub.f32 %v3377_v32, %v685_v54  ;;  %v1285_v32 = vld [vmem:[#allocation2 + $0x90] sm:$0xff] }
 0xa11   :  { %v689_v57 = vrot.slane %v687_v56, 6 }
 0xa13   :  { %690 = vrot.lane.b32.xlu0 %v689_v57, %s3122_s5 }
 0xa85   :  { %v691_v58 = vpop.permute.xlu0 %690 }
 0xa86   :  { %v693_v60 = vmul.f32 %v691_v58, %v673_v47 }
 0xa88   :  { %695 = vrot.lane.b32.xlu1 %v693_v60, %s3123_s7 }
 0xafa   :  { %v696_v61 = vpop.permute.xlu1 %695 }
 0xafb   :  { %v3398_v62 = vadd.f32 %v3036_v52, %v696_v61 }
 0xafd   :  { %v700_v63 = vrot.slane %v3398_v62, 4 }
 0xaff   :  { %701 = vrot.lane.b32.xlu0 %v700_v63, %s3121_s18 }
 0xb71   :  { %v702_v0 = vpop.permute.xlu0 %701 }
 0xb72   :  { %2555 = vmatmul.mubr.msk.f32.vlgmr.msra.gmra.mrb[2].mxu0 %vm289_vm3, %v702_v0 }
 0xb73   :  { %2700 = vmatpush3.bf16.msra.mxu0 %v3304_v38  ;;  %2576 = vmatprep.mubr.msk.f32.mxu0 %vm3119_vm2, %v3120_v43 }
 0xb74   :  { %2701 = vmatprep.subr.bf16.mxu0 %v3118_v39 }
 0xb77   :  { %2703 = vmatpush3.bf16.msra.mxu0 %v3316_v42 }
 0xb78   :  { %2710 = vmatprep.subr.bf16.mxu0 %v3118_v39 }
 0xc45   :  { %v771_v1 = vpop.f32.mrb[2].mxu0 }
 0xc46   :  { %v772_v2 = vadd.f32 %v3348_v55, %v771_v1  ;;  %v2556_v3 = vpop.f32.mrb[3].mxu0 }
 0xc48   :  { %v776_v4 = vrot.slane %v772_v2, 2 }
 0xc4a   :  { %783 = vrot.lane.b32.xlu1 %v776_v4, %s3121_s18  ;;  %v778_v5 = vadd.f32 %v776_v4, %v3352_v59 }
 0xc4c   :  { %v779_v6 = vmul.f32 0.5, %v778_v5 }
 0xc4e   :  { %3037 = vtanh.f32 %v779_v6 }
 0xc58   :  { %v3038_v7 = vpop.eup %3037 }
 0xc59   :  { %v781_v8 = vadd.f32 1.0, %v3038_v7 }
 0xc5b   :  { %v782_v9 = vmul.f32 0.5, %v781_v8 }
 0xcbc   :  { %v784_v10 = vpop.permute.xlu1 %783 }
 0xcbd   :  { %v786_v12 = vmul.f32 %v784_v10, %v782_v9 }
 0xcbf   :  { %788 = vrot.lane.b32.xlu0 %v786_v12, %s3121_s18 }
 0xd31   :  { %v789_v13 = vpop.permute.xlu0 %788 }
 0xd32   :  { %v791_v14 = vadd.f32 %v789_v13, %v3352_v59 }
 0xd34   :  { %3039 = vtanh.f32 %v791_v14 }
 0xd3e   :  { %v3040_v15 = vpop.eup %3039 }
 0xd3f   :  { %v794_v16 = vrot.slane %v3040_v15, 2 }
 0xd41   :  { %v796_v17 = vsub.f32 %v3398_v62, %v794_v16  ;;  %v1711_v62 = vld [vmem:[%s3850_s10 + $0x18] sm:$0xff] }
 0xd43   :  { %v798_v18 = vrot.slane %v796_v17, 6 }
 0xd45   :  { %799 = vrot.lane.b32.xlu1 %v798_v18, %s3122_s5 }
 0xdb7   :  { %v800_v19 = vpop.permute.xlu1 %799 }
 0xdb8   :  { %v802_v20 = vmul.f32 %v800_v19, %v782_v9 }
 0xdba   :  { %804 = vrot.lane.b32.xlu0 %v802_v20, %s3123_s7 }
 0xe2c   :  { %v805_v21 = vpop.permute.xlu0 %804 }
 0xe2d   :  { %v3419_v22 = vadd.f32 %v3040_v15, %v805_v21 }
 0xe2f   :  { %v809_v23 = vrot.slane %v3419_v22, 6 }
 0xe31   :  { %810 = vrot.lane.b32.xlu1 %v809_v23, %s3121_s18 }
 0xea3   :  { %v811_v59 = vpop.permute.xlu1 %810 }
 0xea4   :  { %2566 = vmatmul.mubr.msk.f32.vlgmr.msra.gmra.mrb[10].mxu1 %vm289_vm3, %v811_v59 }
 0xea5   :  { %2706 = vmatpush3.bf16.msra.mxu1 %v3304_v38  ;;  %2587 = vmatprep.mubr.msk.f32.mxu1 %vm3119_vm2, %v3120_v43 }
 0xea6   :  { %2707 = vmatprep.subr.bf16.mxu1 %v3118_v39 }
 0xea9   :  { %2709 = vmatpush3.bf16.msra.mxu1 %v3316_v42 }
 0xf77   :  { %v880_v24 = vpop.f32.mrb[10].mxu1 }
 0xf78   :  { %v881_v25 = vadd.f32 %v3348_v55, %v880_v24  ;;  %v2567_v26 = vpop.f32.mrb[11].mxu1 }
 0xf7a   :  { %890 = vrot.lane.b32.xlu0 %v881_v25, %s3121_s18  ;;  %v884_v27 = vadd.f32 %v881_v25, %v3343_v53 }
 0xf7c   :  { %v885_v28 = vmul.f32 0.5, %v884_v27 }
 0xf7e   :  { %3041 = vtanh.f32 %v885_v28 }
 0xf88   :  { %v3042_v29 = vpop.eup %3041 }
 0xf89   :  { %v887_v30 = vadd.f32 1.0, %v3042_v29 }
 0xf8b   :  { %v888_v31 = vmul.f32 0.5, %v887_v30 }
 0xfec   :  { %v891_v34 = vpop.permute.xlu0 %890 }
 0xfed   :  { %v893_v35 = vmul.f32 %v891_v34, %v888_v31 }
 0xfef   :  { %895 = vrot.lane.b32.xlu1 %v893_v35, %s3121_s18 }
0x1061   :  { %v896_v36 = vpop.permute.xlu1 %895 }
0x1062   :  { %v898_v37 = vadd.f32 %v896_v36, %v3343_v53 }
0x1064   :  { %3043 = vtanh.f32 %v898_v37 }
0x106e   :  { %v3044_v40 = vpop.eup %3043 }
0x106f   :  { %v901_v41 = vrot.slane %v3044_v40, 2 }
0x1071   :  { %v903_v44 = vsub.f32 %v3419_v22, %v901_v41 }
0x1073   :  { %v905_v45 = vrot.slane %v903_v44, 6 }
0x1075   :  { %906 = vrot.lane.b32.xlu0 %v905_v45, %s3122_s5 }
0x10e7   :  { %v907_v46 = vpop.permute.xlu0 %906 }
0x10e8   :  { %v909_v47 = vmul.f32 %v907_v46, %v888_v31 }
0x10ea   :  { %911 = vrot.lane.b32.xlu1 %v909_v47, %s3123_s7 }
0x115c   :  { %v912_v48 = vpop.permute.xlu1 %911 }
0x115d   :  { %v914_v49 = vadd.f32 %v3044_v40, %v912_v48 }
0x115f   :  { %916 = vrot.lane.b32.xlu0 %v914_v49, %s3121_s18 }
0x11d1   :  { %v3440_v50 = vpop.permute.xlu0 %916 }
0x11d2   :  { %2577 = vmatmul.mubr.msk.f32.vlgmr.msra.gmra.mrb[4].mxu0 %vm289_vm3, %v3440_v50 }
0x11d3   :  { %2712 = vmatpush3.bf16.msra.mxu0 %v3304_v38  ;;  %2598 = vmatprep.mubr.msk.f32.mxu0 %vm3119_vm2, %v3120_v43 }
0x11d4   :  { %2713 = vmatprep.subr.bf16.mxu0 %v3118_v39 }
0x11d7   :  { %2715 = vmatpush3.bf16.msra.mxu0 %v3316_v42 }
0x12a5   :  { %v986_v51 = vpop.f32.mrb[4].mxu0 }
0x12a6   :  { %v987_v52 = vadd.f32 %v3348_v55, %v986_v51  ;;  %v2578_v54 = vpop.f32.mrb[5].mxu0 }
0x12a8   :  { %v991_v56 = vrot.slane %v987_v52, 6 }
0x12aa   :  { %998 = vrot.lane.b32.xlu1 %v991_v56, %s3121_s18  ;;  %v993_v57 = vadd.f32 %v991_v56, %v3343_v53 }
0x12ac   :  { %v994_v58 = vmul.f32 0.5, %v993_v57 }
0x12ae   :  { %3045 = vtanh.f32 %v994_v58 }
0x12b8   :  { %v3046_v60 = vpop.eup %3045 }
0x12b9   :  { %v996_v38 = vadd.f32 1.0, %v3046_v60 }
0x12bb   :  { %v997_v61 = vmul.f32 0.5, %v996_v38 }
0x131c   :  { %v999_v0 = vpop.permute.xlu1 %998 }
0x131d   :  { %v1001_v1 = vmul.f32 %v999_v0, %v997_v61 }
0x131f   :  { %1003 = vrot.lane.b32.xlu0 %v1001_v1, %s3121_s18 }
0x1391   :  { %v1004_v2 = vpop.permute.xlu0 %1003 }
0x1392   :  { %v1006_v42 = vadd.f32 %v1004_v2, %v3343_v53  ;;  %v1268_v2 = vld [vmem:[#allocation2 + $0x8] sm:$0xff] }
0x1394   :  { %3047 = vtanh.f32 %v1006_v42  ;;  %v1274_v42 = vld [vmem:[#allocation2 + $0x38] sm:$0xff] }
0x139e   :  { %v3048_v3 = vpop.eup %3047 }
0x139f   :  { %v1009_v4 = vrot.slane %v3048_v3, 2 }
0x13a1   :  { %v1011_v5 = vsub.f32 %v914_v49, %v1009_v4  ;;  %v2716_v4 = vpack.c.bf16 %v1274_v42, %v1268_v2 }
0x13a3   :  { %v1013_v6 = vrot.slane %v1011_v5, 6  ;;  %v1270_v5 = vld [vmem:[#allocation2 + $0x18] sm:$0xff]  ;;  %2717 = vmatprep.subr.bf16.mxu1 %v2716_v4  ;;  %v1321_v4 = vld [vmem:[#allocation2 + $0x1b0] sm:$0xff] }
0x13a5   :  { %1014 = vrot.lane.b32.xlu1 %v1013_v6, %s3122_s5  ;;  %v1276_v6 = vld [vmem:[#allocation2 + $0x48] sm:$0xff] }
0x1417   :  { %v1015_v7 = vpop.permute.xlu1 %1014 }
0x1418   :  { %v1017_v8 = vmul.f32 %v1015_v7, %v997_v61 }
0x141a   :  { %1019 = vrot.lane.b32.xlu0 %v1017_v8, %s3123_s7  ;;  %v2780_v8 = vpack.c.bf16 %v1276_v6, %v1270_v5  ;;  %v1323_v6 = vld [vmem:[#allocation2 + $0x1c0] sm:$0xff] }
0x141c   :  { %2781 = vmatprep.subr.bf16.mxu0 %v2780_v8  ;;  %v1334_v8 = vld [vmem:[#allocation2 + $0x218] sm:$0xff] }
0x148c   :  { %v1020_v9 = vpop.permute.xlu0 %1019 }
0x148d   :  { %v1022_v10 = vadd.f32 %v3048_v3, %v1020_v9  ;;  %v1267_v3 = vld [vmem:[#allocation2] sm:$0xff]  ;;  %v1269_v9 = vld [vmem:[#allocation2 + $0x10] sm:$0xff] }
0x148f   :  { %v1024_v12 = vrot.slane %v1022_v10, 2 }
0x1491   :  { %1025 = vrot.lane.b32.xlu1 %v1024_v12, %s3121_s18  ;;  %v3015_v1 = vpack.i.bf16 %v591_v33, %v1024_v12 }
0x1503   :  { %v1026_v13 = vpop.permute.xlu1 %1025 }
0x1504   :  { %2588 = vmatmul.mubr.msk.f32.vlgmr.msra.gmra.mrb[12].mxu1 %vm289_vm3, %v1026_v13  ;;  %v1280_v13 = vld [vmem:[#allocation2 + $0x68] sm:$0xff] }
0x15d7   :  { %v1095_v14 = vpop.f32.mrb[12].mxu1 }
0x15d8   :  { %v1096_v15 = vadd.f32 %v3348_v55, %v1095_v14  ;;  %v2589_v16 = vpop.f32.mrb[13].mxu1 }
0x15d9   :  { %v1279_v16 = vld [vmem:[#allocation2 + $0x60] sm:$0xff] }
0x15da   :  { %v1100_v17 = vrot.slane %v1096_v15, 4  ;;  %v1286_v15 = vld [vmem:[#allocation2 + $0x98] sm:$0xff] }
0x15db   :  { %v2720_v12 = vpack.c.bf16 %v1286_v15, %v1280_v13 }
0x15dc   :  { %1107 = vrot.lane.b32.xlu0 %v1100_v17, %s3121_s18  ;;  %v1102_v18 = vadd.f32 %v1100_v17, %v3343_v53  ;;  %v2722_v17 = vpack.c.bf16 %v1285_v32, %v1279_v16  ;;  %v1327_v16 = vld [vmem:[#allocation2 + $0x1e0] sm:$0xff]  ;;  %v1333_v32 = vld [vmem:[#allocation2 + $0x210] sm:$0xff] }
0x15de   :  { %v1103_v19 = vmul.f32 0.5, %v1102_v18  ;;  %v1282_v18 = vld [vmem:[#allocation2 + $0x78] sm:$0xff] }
0x15e0   :  { %3049 = vtanh.f32 %v1103_v19  ;;  %v1288_v19 = vld [vmem:[#allocation2 + $0xa8] sm:$0xff] }
0x15ea   :  { %v3050_v20 = vpop.eup %3049 }
0x15eb   :  { %v1105_v21 = vadd.f32 1.0, %v3050_v20  ;;  %v1281_v20 = vld [vmem:[#allocation2 + $0x70] sm:$0xff] }
0x15ed   :  { %v1106_v59 = vmul.f32 0.5, %v1105_v21 }
0x164e   :  { %v1108_v24 = vpop.permute.xlu0 %1107 }
0x164f   :  { %v1110_v25 = vmul.f32 %v1108_v24, %v1106_v59  ;;  %v1287_v24 = vld [vmem:[#allocation2 + $0xa0] sm:$0xff] }
0x1651   :  { %1112 = vrot.lane.b32.xlu1 %v1110_v25, %s3121_s18  ;;  %v1292_v25 = vld [vmem:[#allocation2 + $0xc8] sm:$0xff] }
0x16c3   :  { %v1113_v26 = vpop.permute.xlu1 %1112 }
0x16c4   :  { %v1115_v27 = vadd.f32 %v1113_v26, %v3343_v53  ;;  %v1298_v26 = vld [vmem:[#allocation2 + $0xf8] sm:$0xff] }
0x16c6   :  { %3051 = vtanh.f32 %v1115_v27  ;;  %v2786_v27 = vpack.c.bf16 %v1287_v24, %v1281_v20  ;;  %v1342_v20 = vld [vmem:[#allocation2 + $0x258] sm:$0xff] }
0x16d0   :  { %v3052_v28 = vpop.eup %3051 }
0x16d1   :  { %v1118_v29 = vrot.slane %v3052_v28, 2 }
0x16d3   :  { %v1120_v30 = vsub.f32 %v1022_v10, %v1118_v29  ;;  %v1275_v10 = vld [vmem:[#allocation2 + $0x40] sm:$0xff] }
0x16d4   :  { %v2782_v14 = vpack.c.bf16 %v1275_v10, %v1269_v9  ;;  %v1291_v29 = vld [vmem:[#allocation2 + $0xc0] sm:$0xff]  ;;  %v1330_v9 = vld [vmem:[#allocation2 + $0x1f8] sm:$0xff]  ;;  %v1336_v10 = vld [vmem:[#allocation2 + $0x228] sm:$0xff] }
0x16d5   :  { %v1122_v31 = vrot.slane %v1120_v30, 6  ;;  %v1297_v30 = vld [vmem:[#allocation2 + $0xf0] sm:$0xff] }
0x16d7   :  { %1123 = vrot.lane.b32.xlu0 %v1122_v31, %s3122_s5  ;;  %v1294_v31 = vld [vmem:[#allocation2 + $0xd8] sm:$0xff] }
0x1749   :  { %v1124_v34 = vpop.permute.xlu0 %1123 }
0x174a   :  { %v1126_v35 = vmul.f32 %v1124_v34, %v1106_v59  ;;  %v2784_v59 = vpack.c.bf16 %v1288_v19, %v1282_v18  ;;  %v1300_v34 = vld [vmem:[#allocation2 + $0x108] sm:$0xff]  ;;  %v1346_v19 = vld [vmem:[#allocation2 + $0x278] sm:$0xff] }
0x174b   :  { %v1340_v18 = vld [vmem:[#allocation2 + $0x248] sm:$0xff] }
0x174c   :  { %1128 = vrot.lane.b32.xlu1 %v1126_v35, %s3123_s7  ;;  %v1293_v35 = vld [vmem:[#allocation2 + $0xd0] sm:$0xff] }
0x17be   :  { %v1129_v36 = vpop.permute.xlu1 %1128 }
0x17bf   :  { %v3465_v37 = vadd.f32 %v3052_v28, %v1129_v36  ;;  %v2724_v28 = vpack.c.bf16 %v1298_v26, %v1292_v25  ;;  %v1299_v36 = vld [vmem:[#allocation2 + $0x100] sm:$0xff]  ;;  %v2740_v25 = vpack.c.bf16 %v1346_v19, %v1340_v18 }
0x17c0   :  { %v1339_v26 = vld [vmem:[#allocation2 + $0x240] sm:$0xff] }
0x17c1   :  { %v1133_v40 = vrot.slane %v3465_v37, 4 }
0x17c3   :  { %1134 = vrot.lane.b32.xlu0 %v1133_v40, %s3121_s18 }
0x1835   :  { %v1135_v41 = vpop.permute.xlu0 %1134 }
0x1836   :  { %2599 = vmatmul.mubr.msk.f32.vlgmr.msra.gmra.mrb[6].mxu0 %vm289_vm3, %v1135_v41  ;;  %v2726_v41 = vpack.c.bf16 %v1297_v30, %v1291_v29  ;;  %v1347_v30 = vld [vmem:[#allocation2 + $0x280] sm:$0xff] }
0x1837   :  { %2783 = vmatpush1.bf16.msra.mxu0 %v2782_v14 }
0x1838   :  { %2785 = vmatprep.subr.bf16.mxu0 %v2784_v59  ;;  %v2738_v59 = vpack.c.bf16 %v1333_v32, %v1327_v16  ;;  %v1388_v16 = vld [vmem:[#allocation2 + $0x3c8] sm:$0xff]  ;;  %v1394_v32 = vld [vmem:[#allocation2 + $0x3f8] sm:$0xff] }
0x1839   :  { %v2756_v19 = vpack.c.bf16 %v1394_v32, %v1388_v16 }
0x183b   :  { %2787 = vmatpush1.bf16.msra.mxu0 %v2786_v27  ;;  %v1345_v27 = vld [vmem:[#allocation2 + $0x270] sm:$0xff] }
0x1909   :  { %v1204_v44 = vpop.f32.mrb[6].mxu0 }
0x190a   :  { %v1205_v45 = vadd.f32 %v3348_v55, %v1204_v44  ;;  %v2600_v46 = vpop.f32.mrb[7].mxu0  ;;  %v2788_v44 = vpack.c.bf16 %v1300_v34, %v1294_v31  ;;  %v1352_v31 = vld [vmem:[#allocation2 + $0x2a8] sm:$0xff]  ;;  %v1358_v34 = vld [vmem:[#allocation2 + $0x2d8] sm:$0xff] }
0x190b   :  { %v1310_v46 = vld [vmem:[#allocation2 + $0x158] sm:$0xff] }
0x190c   :  { %v1209_v47 = vrot.slane %v1205_v45, 2  ;;  %v1304_v45 = vld [vmem:[#allocation2 + $0x128] sm:$0xff]  ;;  %2789 = vmatprep.subr.bf16.mxu0 %v2788_v44 }
0x190e   :  { %1216 = vrot.lane.b32.xlu1 %v1209_v47, %s3121_s18  ;;  %v1211_v48 = vadd.f32 %v1209_v47, %v3343_v53  ;;  %v1303_v47 = vld [vmem:[#allocation2 + $0x120] sm:$0xff] }
0x1910   :  { %v1212_v49 = vmul.f32 0.5, %v1211_v48  ;;  %v2790_v48 = vpack.c.bf16 %v1299_v36, %v1293_v35  ;;  %v1354_v35 = vld [vmem:[#allocation2 + $0x2b8] sm:$0xff]  ;;  %v1360_v36 = vld [vmem:[#allocation2 + $0x2e8] sm:$0xff] }
0x1912   :  { %3053 = vtanh.f32 %v1212_v49  ;;  %v2728_v49 = vpack.c.bf16 %v1310_v46, %v1304_v45  ;;  %2791 = vmatpush1.bf16.msra.mxu0 %v2790_v48  ;;  %v2744_v45 = vpack.c.bf16 %v1358_v34, %v1352_v31  ;;  %v1351_v46 = vld [vmem:[#allocation2 + $0x2a0] sm:$0xff]  ;;  %v1353_v48 = vld [vmem:[#allocation2 + $0x2b0] sm:$0xff] }
0x191c   :  { %v3054_v51 = vpop.eup %3053 }
0x191d   :  { %v1214_v52 = vadd.f32 1.0, %v3054_v51  ;;  %v1309_v51 = vld [vmem:[#allocation2 + $0x150] sm:$0xff] }
0x191f   :  { %v1215_v54 = vmul.f32 0.5, %v1214_v52  ;;  %v1306_v52 = vld [vmem:[#allocation2 + $0x138] sm:$0xff] }
0x1980   :  { %v1217_v56 = vpop.permute.xlu1 %1216 }
0x1981   :  { %v1219_v57 = vmul.f32 %v1217_v56, %v1215_v54 }
0x1983   :  { %1221 = vrot.lane.b32.xlu0 %v1219_v57, %s3121_s18  ;;  %v1305_v57 = vld [vmem:[#allocation2 + $0x130] sm:$0xff] }
0x19f5   :  { %v1222_v58 = vpop.permute.xlu0 %1221 }
0x19f6   :  { %v1224_v60 = vadd.f32 %v1222_v58, %v3343_v53  ;;  %v1273_v53 = vld [vmem:[#allocation2 + $0x30] sm:$0xff]  ;;  %v1311_v58 = vld [vmem:[#allocation2 + $0x160] sm:$0xff] }
0x19f7   :  { %v2718_v7 = vpack.c.bf16 %v1273_v53, %v1267_v3  ;;  %v2794_v2 = vpack.c.bf16 %v1311_v58, %v1305_v57  ;;  %v1315_v3 = vld [vmem:[#allocation2 + $0x180] sm:$0xff]  ;;  %v1317_v53 = vld [vmem:[#allocation2 + $0x190] sm:$0xff]  ;;  %v1372_v57 = vld [vmem:[#allocation2 + $0x348] sm:$0xff] }
0x19f8   :  { %3055 = vtanh.f32 %v1224_v60  ;;  %v1316_v60 = vld [vmem:[#allocation2 + $0x188] sm:$0xff]  ;;  %v2734_v13 = vpack.c.bf16 %v1321_v4, %v1315_v3  ;;  %v2798_v14 = vpack.c.bf16 %v1323_v6, %v1317_v53  ;;  %v1382_v4 = vld [vmem:[#allocation2 + $0x398] sm:$0xff] }
0x19f9   :  { %2719 = vmatpush1.bf16.msra.mxu1 %v2718_v7  ;;  %v1328_v7 = vld [vmem:[#allocation2 + $0x1e8] sm:$0xff]  ;;  %v1378_v53 = vld [vmem:[#allocation2 + $0x378] sm:$0xff] }
0x19fa   :  { %2721 = vmatprep.subr.bf16.mxu1 %v2720_v12  ;;  %v2736_v15 = vpack.c.bf16 %v1334_v8, %v1328_v7  ;;  %v2800_v12 = vpack.c.bf16 %v1336_v10, %v1330_v9  ;;  %v1376_v3 = vld [vmem:[#allocation2 + $0x368] sm:$0xff]  ;;  %v1375_v9 = vld [vmem:[#allocation2 + $0x360] sm:$0xff]  ;;  %v1381_v10 = vld [vmem:[#allocation2 + $0x390] sm:$0xff] }
0x19fb   :  { %v2752_v8 = vpack.c.bf16 %v1382_v4, %v1376_v3 }
0x19fd   :  { %2723 = vmatpush1.bf16.msra.mxu1 %v2722_v17  ;;  %v1335_v17 = vld [vmem:[#allocation2 + $0x220] sm:$0xff] }
0x19fe   :  { %2725 = vmatprep.subr.bf16.mxu1 %v2724_v28  ;;  %v1341_v28 = vld [vmem:[#allocation2 + $0x250] sm:$0xff] }
0x19ff   :  { %v2806_v44 = vpack.c.bf16 %v1347_v30, %v1341_v28  ;;  %v1402_v28 = vld [vmem:[#allocation2 + $0x438] sm:$0xff] }
0x1a01   :  { %2727 = vmatpush1.bf16.msra.mxu1 %v2726_v41  ;;  %v2742_v41 = vpack.c.bf16 %v1345_v27, %v1339_v26  ;;  %v1400_v26 = vld [vmem:[#allocation2 + $0x428] sm:$0xff]  ;;  %v1406_v27 = vld [vmem:[#allocation2 + $0x458] sm:$0xff] }
0x1a02   :  { %v3477_v55 = vpop.eup %3055  ;;  %2729 = vmatprep.subr.bf16.mxu1 %v2728_v49  ;;  %v2808_v49 = vpack.c.bf16 %v1360_v36, %v1354_v35  ;;  %v2760_v34 = vpack.c.bf16 %v1406_v27, %v1400_v26  ;;  %v1399_v35 = vld [vmem:[#allocation2 + $0x420] sm:$0xff]  ;;  %v1405_v36 = vld [vmem:[#allocation2 + $0x450] sm:$0xff] }
0x1a03   :  { %v1227_v38 = vrot.slane %v3477_v55, 2  ;;  %v1447_v26 = vld [vmem:[#allocation2 + $0x5a0] sm:$0xff]  ;;  %v1453_v27 = vld [vmem:[#allocation2 + $0x5d0] sm:$0xff] }
0x1a05   :  { %v1229_v61 = vsub.f32 %v3465_v37, %v1227_v38  ;;  %v1322_v38 = vld [vmem:[#allocation2 + $0x1b8] sm:$0xff]  ;;  %v1710_v37 = vld [vmem:[%s3850_s10 + $0x10] sm:$0xff] }
0x1a06   :  { %v2732_v42 = vpack.c.bf16 %v1322_v38, %v1316_v60 }
0x1a07   :  { %v1231_v0 = vrot.slane %v1229_v61, 6  ;;  %v2730_v61 = vpack.c.bf16 %v1309_v51, %v1303_v47  ;;  %v1357_v47 = vld [vmem:[#allocation2 + $0x2d0] sm:$0xff]  ;;  %v1359_v51 = vld [vmem:[#allocation2 + $0x2e0] sm:$0xff] }
0x1a08   :  { %v2746_v58 = vpack.c.bf16 %v1357_v47, %v1351_v46  ;;  %v2810_v60 = vpack.c.bf16 %v1359_v51, %v1353_v48  ;;  %v1412_v46 = vld [vmem:[#allocation2 + $0x488] sm:$0xff]  ;;  %v1418_v47 = vld [vmem:[#allocation2 + $0x4b8] sm:$0xff]  ;;  %v2762_v51 = vpack.c.bf16 %v1405_v36, %v1399_v35 }
0x1a09   :  { %1232 = vrot.lane.b32.xlu1 %v1231_v0, %s3122_s5  ;;  %v1318_v0 = vld [vmem:[#allocation2 + $0x198] sm:$0xff]  ;;  %2731 = vmatpush1.bf16.msra.mxu1 %v2730_v61  ;;  %v1363_v61 = vld [vmem:[#allocation2 + $0x300] sm:$0xff] }
0x1a0a   :  { %2733 = vmatprep.subr.bf16.mxu1 %v2732_v42  ;;  %v1371_v42 = vld [vmem:[#allocation2 + $0x340] sm:$0xff]  ;;  %v1414_v48 = vld [vmem:[#allocation2 + $0x498] sm:$0xff] }
0x1a0d   :  { %3016 = vrot.lane.b32.xlu1 %v3015_v1, %s3122_s5  ;;  %v1324_v1 = vld [vmem:[#allocation2 + $0x1c8] sm:$0xff]  ;;  %2735 = vmatpush1.bf16.msra.mxu1 %v2734_v13  ;;  %v1377_v13 = vld [vmem:[#allocation2 + $0x370] sm:$0xff] }
0x1a0e   :  { %v2796_v5 = vpack.c.bf16 %v1324_v1, %v1318_v0  ;;  %2737 = vmatprep.subr.bf16.mxu1 %v2736_v15  ;;  %v1369_v0 = vld [vmem:[#allocation2 + $0x330] sm:$0xff]  ;;  %v1383_v15 = vld [vmem:[#allocation2 + $0x3a0] sm:$0xff] }
0x1a0f   :  { %v1365_v1 = vld [vmem:[#allocation2 + $0x310] sm:$0xff]  ;;  %v2750_v6 = vpack.c.bf16 %v1369_v0, %v1363_v61  ;;  %v2818_v18 = vpack.c.bf16 %v1383_v15, %v1377_v13  ;;  %v1424_v61 = vld [vmem:[#allocation2 + $0x4e8] sm:$0xff]  ;;  %v1430_v0 = vld [vmem:[#allocation2 + $0x518] sm:$0xff] }
0x1a10   :  { %v2814_v7 = vpack.c.bf16 %v1371_v42, %v1365_v1  ;;  %v1426_v1 = vld [vmem:[#allocation2 + $0x4f8] sm:$0xff]  ;;  %v2768_v4 = vpack.c.bf16 %v1430_v0, %v1424_v61 }
0x1a11   :  { %2739 = vmatpush1.bf16.msra.mxu1 %v2738_v59  ;;  %v1389_v59 = vld [vmem:[#allocation2 + $0x3d0] sm:$0xff]  ;;  %v1438_v13 = vld [vmem:[#allocation2 + $0x558] sm:$0xff] }
0x1a12   :  { %2741 = vmatprep.subr.bf16.mxu1 %v2740_v25  ;;  %v1395_v25 = vld [vmem:[#allocation2 + $0x400] sm:$0xff]  ;;  %v1290_v0 = vld [vmem:[#allocation2 + $0xb8] sm:$0xff] }
0x1a13   :  { %v2822_v31 = vpack.c.bf16 %v1395_v25, %v1389_v59 }
0x1a15   :  { %2743 = vmatpush1.bf16.msra.mxu1 %v2742_v41  ;;  %v1401_v41 = vld [vmem:[#allocation2 + $0x430] sm:$0xff] }
0x1a16   :  { %2745 = vmatprep.subr.bf16.mxu1 %v2744_v45  ;;  %v1407_v45 = vld [vmem:[#allocation2 + $0x460] sm:$0xff] }
0x1a19   :  { %2747 = vmatpush1.bf16.msra.mxu1 %v2746_v58  ;;  %v1413_v58 = vld [vmem:[#allocation2 + $0x490] sm:$0xff] }
0x1a7b   :  { %v1233_v33 = vpop.permute.xlu1 %1232 }
0x1a7c   :  { %v1235_v21 = vmul.f32 %v1233_v33, %v1215_v54  ;;  %v1312_v54 = vld [vmem:[#allocation2 + $0x168] sm:$0xff]  ;;  %v1329_v33 = vld [vmem:[#allocation2 + $0x1f0] sm:$0xff] }
0x1a7d   :  { %v2792_v56 = vpack.c.bf16 %v1312_v54, %v1306_v52  ;;  %v2802_v24 = vpack.c.bf16 %v1335_v17, %v1329_v33  ;;  %v1364_v52 = vld [vmem:[#allocation2 + $0x308] sm:$0xff]  ;;  %v1370_v54 = vld [vmem:[#allocation2 + $0x338] sm:$0xff]  ;;  %v2754_v17 = vpack.c.bf16 %v1381_v10, %v1375_v9 }
0x1a7e   :  { %1237 = vrot.lane.b32.xlu0 %v1235_v21, %s3123_s7  ;;  %v1348_v21 = vld [vmem:[#allocation2 + $0x288] sm:$0xff]  ;;  %v2748_v38 = vpack.c.bf16 %v1370_v54, %v1364_v52  ;;  %v1390_v33 = vld [vmem:[#allocation2 + $0x3d8] sm:$0xff]  ;;  %v2826_v52 = vpack.c.bf16 %v1407_v45, %v1401_v41  ;;  %v2764_v54 = vpack.c.bf16 %v1418_v47, %v1412_v46 }
0x1a7f   :  { %2793 = vmatprep.subr.bf16.mxu0 %v2792_v56  ;;  %v2804_v29 = vpack.c.bf16 %v1348_v21, %v1342_v20  ;;  %v1366_v56 = vld [vmem:[#allocation2 + $0x318] sm:$0xff]  ;;  %v1387_v20 = vld [vmem:[#allocation2 + $0x3c0] sm:$0xff]  ;;  %v1393_v21 = vld [vmem:[#allocation2 + $0x3f0] sm:$0xff] }
0x1a80   :  { %2795 = vmatpush1.bf16.msra.mxu0 %v2794_v2  ;;  %v2812_v2 = vpack.c.bf16 %v1372_v57, %v1366_v56  ;;  %2749 = vmatprep.subr.bf16.mxu1 %v2748_v38  ;;  %v2758_v30 = vpack.c.bf16 %v1393_v21, %v1387_v20  ;;  %v1411_v56 = vld [vmem:[#allocation2 + $0x480] sm:$0xff]  ;;  %v1417_v57 = vld [vmem:[#allocation2 + $0x4b0] sm:$0xff]  ;;  %v1436_v9 = vld [vmem:[#allocation2 + $0x548] sm:$0xff] }
0x1a81   :  { %2797 = vmatprep.subr.bf16.mxu0 %v2796_v5  ;;  %v1384_v5 = vld [vmem:[#allocation2 + $0x3a8] sm:$0xff]  ;;  %2751 = vmatpush1.bf16.msra.mxu1 %v2750_v6  ;;  %v1419_v38 = vld [vmem:[#allocation2 + $0x4c0] sm:$0xff]  ;;  %v2766_v42 = vpack.c.bf16 %v1417_v57, %v1411_v56  ;;  %v1425_v6 = vld [vmem:[#allocation2 + $0x4f0] sm:$0xff]  ;;  %v3017_v56 = vpop.permute.xlu1 %3016 }
0x1a82   :  { %2753 = vmatprep.subr.bf16.mxu1 %v2752_v8  ;;  %v2830_v3 = vpack.c.bf16 %v1419_v38, %v1413_v58  ;;  %v1431_v8 = vld [vmem:[#allocation2 + $0x520] sm:$0xff]  ;;  %v1442_v10 = vld [vmem:[#allocation2 + $0x578] sm:$0xff]  ;;  %v1448_v20 = vld [vmem:[#allocation2 + $0x5a8] sm:$0xff]  ;;  %v3019_v57 = vunpack.i.h.bf16 %v3017_v56  ;;  %v3018_v58 = vunpack.i.l.bf16 %v3017_v56 }
0x1a83   :  { %v2834_v16 = vpack.c.bf16 %v1431_v8, %v1425_v6  ;;  %v2772_v32 = vpack.c.bf16 %v1442_v10, %v1436_v9  ;;  %v1454_v21 = vld [vmem:[#allocation2 + $0x5d8] sm:$0xff]  ;;  %v1272_v41 = vld [vmem:[#allocation2 + $0x28] sm:$0xff]  ;;  %v1283_v9 = vld [vmem:[#allocation2 + $0x80] sm:$0xff] }
0x1a84   :  { %2799 = vmatpush1.bf16.msra.mxu0 %v2798_v14  ;;  %v2816_v14 = vpack.c.bf16 %v1384_v5, %v1378_v53  ;;  %v1423_v53 = vld [vmem:[#allocation2 + $0x4e0] sm:$0xff]  ;;  %v1429_v5 = vld [vmem:[#allocation2 + $0x510] sm:$0xff]  ;;  %v2776_v25 = vpack.c.bf16 %v1454_v21, %v1448_v20  ;;  %v1264_v22 = vsel %vm289_vm3, %v3440_v50, %v3018_v58  ;;  %v1284_v38 = vld [vmem:[#allocation2 + $0x88] sm:$0xff] }
0x1a85   :  { %2801 = vmatprep.subr.bf16.mxu0 %v2800_v12  ;;  %v1396_v12 = vld [vmem:[#allocation2 + $0x408] sm:$0xff]  ;;  %2755 = vmatpush1.bf16.msra.mxu1 %v2754_v17  ;;  %v2770_v15 = vpack.c.bf16 %v1429_v5, %v1423_v53  ;;  %v1437_v17 = vld [vmem:[#allocation2 + $0x550] sm:$0xff]  ;;  %v2848_v8 = vpack.c.bf16 %v1290_v0, %v1284_v38  ;;  %v1314_v20 = vld [vmem:[#allocation2 + $0x178] sm:$0xff] }
0x1a86   :  { %2757 = vmatprep.subr.bf16.mxu1 %v2756_v19  ;;  %v1443_v19 = vld [vmem:[#allocation2 + $0x580] sm:$0xff]  ;;  %v1726_v50 = vld [vmem:[%s3850_s10 + $0x90] sm:$0xff]  ;;  %v1338_v56 = vld [vmem:[#allocation2 + $0x238] sm:$0xff] }
0x1a87   :  { %v1289_v10 = vld [vmem:[#allocation2 + $0xb0] sm:$0xff]  ;;  %v1716_v58 = vld [vmem:[%s3850_s10 + $0x40] sm:$0xff] }
0x1a88   :  { %2803 = vmatpush1.bf16.msra.mxu0 %v2802_v24  ;;  %v2820_v24 = vpack.c.bf16 %v1396_v12, %v1390_v33  ;;  %v1435_v33 = vld [vmem:[#allocation2 + $0x540] sm:$0xff]  ;;  %v1441_v12 = vld [vmem:[#allocation2 + $0x570] sm:$0xff] }
0x1a89   :  { %2805 = vmatprep.subr.bf16.mxu0 %v2804_v29  ;;  %v1408_v29 = vld [vmem:[#allocation2 + $0x468] sm:$0xff]  ;;  %2759 = vmatpush1.bf16.msra.mxu1 %v2758_v30  ;;  %v2774_v59 = vpack.c.bf16 %v1441_v12, %v1435_v33  ;;  %v1295_v12 = vld [vmem:[#allocation2 + $0xe0] sm:$0xff]  ;;  %v1337_v0 = vld [vmem:[#allocation2 + $0x230] sm:$0xff] }
0x1a8a   :  { %2761 = vmatprep.subr.bf16.mxu1 %v2760_v34  ;;  %v1456_v30 = vld [vmem:[#allocation2 + $0x5e8] sm:$0xff]  ;;  %v1455_v34 = vld [vmem:[#allocation2 + $0x5e0] sm:$0xff] }
0x1a8c   :  { %2807 = vmatpush1.bf16.msra.mxu0 %v2806_v44  ;;  %v2824_v44 = vpack.c.bf16 %v1408_v29, %v1402_v28  ;;  %v1450_v28 = vld [vmem:[#allocation2 + $0x5b8] sm:$0xff]  ;;  %v2778_v29 = vpack.c.bf16 %v1453_v27, %v1447_v26 }
0x1a8d   :  { %2809 = vmatprep.subr.bf16.mxu0 %v2808_v49  ;;  %v1420_v49 = vld [vmem:[#allocation2 + $0x4c8] sm:$0xff]  ;;  %2763 = vmatpush1.bf16.msra.mxu1 %v2762_v51  ;;  %v2840_v35 = vpack.c.bf16 %v1456_v30, %v1450_v28  ;;  %v1724_v51 = vld [vmem:[%s3850_s10 + $0x80] sm:$0xff]  ;;  %v1731_v26 = vld [vmem:[%s3850_s10 + $0xb8] sm:$0xff] }
0x1a8e   :  { %2765 = vmatprep.subr.bf16.mxu1 %v2764_v54  ;;  %v1313_v30 = vld [vmem:[#allocation2 + $0x170] sm:$0xff] }
0x1a90   :  { %2811 = vmatpush1.bf16.msra.mxu0 %v2810_v60  ;;  %v2828_v60 = vpack.c.bf16 %v1420_v49, %v1414_v48 }
0x1a91   :  { %2813 = vmatprep.subr.bf16.mxu0 %v2812_v2  ;;  %v1432_v2 = vld [vmem:[#allocation2 + $0x528] sm:$0xff]  ;;  %2767 = vmatpush1.bf16.msra.mxu1 %v2766_v42 }
0x1a92   :  { %2769 = vmatprep.subr.bf16.mxu1 %v2768_v4  ;;  %v1265_v4 = vsel %vm1260_vm4, %v1264_v22, %v1133_v40  ;;  %v1729_v40 = vld [vmem:[%s3850_s10 + $0xa8] sm:$0xff]  ;;  %v1734_v22 = vld [vmem:[%s3850_s10 + $0xd0] sm:$0xff] }
0x1a94   :  { %2815 = vmatpush1.bf16.msra.mxu0 %v2814_v7  ;;  %v2832_v7 = vpack.c.bf16 %v1432_v2, %v1426_v1  ;;  %v1708_v1 = vld [vmem:[%s3850_s10] sm:$0xff]  ;;  %v1709_v2 = vld [vmem:[%s3850_s10 + $0x8] sm:$0xff] }
0x1a95   :  { %2817 = vmatprep.subr.bf16.mxu0 %v2816_v14  ;;  %v1444_v14 = vld [vmem:[#allocation2 + $0x588] sm:$0xff]  ;;  %2771 = vmatpush1.bf16.msra.mxu1 %v2770_v15  ;;  %v1302_v15 = vld [vmem:[#allocation2 + $0x118] sm:$0xff] }
0x1a96   :  { %2773 = vmatprep.subr.bf16.mxu1 %v2772_v32  ;;  %v2850_v32 = vpack.c.bf16 %v1289_v10, %v1283_v9  ;;  %v1349_v9 = vld [vmem:[#allocation2 + $0x290] sm:$0xff] }
0x1a98   :  { %2819 = vmatpush1.bf16.msra.mxu0 %v2818_v18  ;;  %v2836_v18 = vpack.c.bf16 %v1444_v14, %v1438_v13  ;;  %v1296_v13 = vld [vmem:[#allocation2 + $0xe8] sm:$0xff]  ;;  %v2910_v14 = vpack.c.bf16 %v1709_v2, %v1708_v1 }
0x1a99   :  { %2821 = vmatprep.subr.bf16.mxu0 %v2820_v24  ;;  %v2838_v24 = vpack.c.bf16 %v1443_v19, %v1437_v17  ;;  %2775 = vmatpush1.bf16.msra.mxu1 %v2774_v59  ;;  %v2852_v33 = vpack.c.bf16 %v1302_v15, %v1296_v13  ;;  %v1301_v17 = vld [vmem:[#allocation2 + $0x110] sm:$0xff]  ;;  %v2914_v19 = vpack.c.bf16 %v1711_v62, %v1710_v37  ;;  %v1712_v59 = vld [vmem:[%s3850_s10 + $0x20] sm:$0xff]  ;;  %v1344_v1 = vld [vmem:[#allocation2 + $0x268] sm:$0xff] }
0x1a9a   :  { %2777 = vmatprep.subr.bf16.mxu1 %v2776_v25  ;;  %v1730_v25 = vld [vmem:[%s3850_s10 + $0xb0] sm:$0xff]  ;;  %v2854_v27 = vpack.c.bf16 %v1301_v17, %v1295_v12  ;;  %v1356_v13 = vld [vmem:[#allocation2 + $0x2c8] sm:$0xff]  ;;  %v1355_v62 = vld [vmem:[#allocation2 + $0x2c0] sm:$0xff] }
0x1a9b   :  { %v1367_v17 = vld [vmem:[#allocation2 + $0x320] sm:$0xff] }
0x1a9c   :  { %2823 = vmatpush1.bf16.msra.mxu0 %v2822_v31  ;;  %v1449_v31 = vld [vmem:[#allocation2 + $0x5b0] sm:$0xff] }
0x1a9d   :  { %2825 = vmatprep.subr.bf16.mxu0 %v2824_v44  ;;  %v2842_v36 = vpack.c.bf16 %v1455_v34, %v1449_v31  ;;  %2779 = vmatpush1.bf16.msra.mxu1 %v2778_v29  ;;  %v1278_v44 = vld [vmem:[#allocation2 + $0x58] sm:$0xff]  ;;  %v1307_v29 = vld [vmem:[#allocation2 + $0x140] sm:$0xff]  ;;  %v1320_v31 = vld [vmem:[#allocation2 + $0x1a8] sm:$0xff] }
0x1a9e   :  { %v2844_v45 = vpack.c.bf16 %v1278_v44, %v1272_v41  ;;  %v1714_v41 = vld [vmem:[%s3850_s10 + $0x30] sm:$0xff]  ;;  %v1715_v44 = vld [vmem:[%s3850_s10 + $0x38] sm:$0xff] }
0x1aa0   :  { %2827 = vmatpush1.bf16.msra.mxu0 %v2826_v52  ;;  %2845 = vmatprep.subr.bf16.mxu1 %v2844_v45  ;;  %v1725_v52 = vld [vmem:[%s3850_s10 + $0x88] sm:$0xff]  ;;  %v1732_v45 = vld [vmem:[%s3850_s10 + $0xc0] sm:$0xff] }
0x1aa1   :  { %2829 = vmatprep.subr.bf16.mxu0 %v2828_v60  ;;  %v2908_v54 = vpack.c.bf16 %v1725_v52, %v1724_v51  ;;  %v1277_v60 = vld [vmem:[#allocation2 + $0x50] sm:$0xff]  ;;  %v1332_v52 = vld [vmem:[#allocation2 + $0x208] sm:$0xff] }
0x1aa2   :  { %v1325_v51 = vld [vmem:[#allocation2 + $0x1d0] sm:$0xff]  ;;  %v2864_v38 = vpack.c.bf16 %v1338_v56, %v1332_v52  ;;  %v1434_v56 = vld [vmem:[#allocation2 + $0x538] sm:$0xff] }
0x1aa3   :  { %v1421_v52 = vld [vmem:[#allocation2 + $0x4d0] sm:$0xff] }
0x1aa4   :  { %2831 = vmatpush1.bf16.msra.mxu0 %v2830_v3  ;;  %v1727_v3 = vld [vmem:[%s3850_s10 + $0x98] sm:$0xff] }
0x1aa5   :  { %2833 = vmatprep.subr.bf16.mxu0 %v2832_v7 }
0x1aa8   :  { %2835 = vmatpush1.bf16.msra.mxu0 %v2834_v16  ;;  %v2912_v16 = vpack.c.bf16 %v1727_v3, %v1726_v50  ;;  %v1718_v50 = vld [vmem:[%s3850_s10 + $0x50] sm:$0xff]  ;;  %v1719_v3 = vld [vmem:[%s3850_s10 + $0x58] sm:$0xff] }
0x1aa9   :  { %2837 = vmatprep.subr.bf16.mxu0 %v2836_v18  ;;  %v1308_v18 = vld [vmem:[#allocation2 + $0x148] sm:$0xff]  ;;  %v2930_v10 = vpack.c.bf16 %v1719_v3, %v1718_v50  ;;  %v1451_v3 = vld [vmem:[#allocation2 + $0x5c0] sm:$0xff] }
0x1aaa   :  { %v2856_v28 = vpack.c.bf16 %v1314_v20, %v1308_v18  ;;  %v1373_v18 = vld [vmem:[#allocation2 + $0x350] sm:$0xff]  ;;  %v1386_v20 = vld [vmem:[#allocation2 + $0x3b8] sm:$0xff] }
0x1aac   :  { %2839 = vmatpush1.bf16.msra.mxu0 %v2838_v24  ;;  %v1713_v24 = vld [vmem:[%s3850_s10 + $0x28] sm:$0xff] }
0x1aad   :  { %2841 = vmatprep.subr.bf16.mxu0 %v2840_v35  ;;  %v2918_v34 = vpack.c.bf16 %v1713_v24, %v1712_v59  ;;  %v1326_v35 = vld [vmem:[#allocation2 + $0x1d8] sm:$0xff]  ;;  %v1379_v24 = vld [vmem:[#allocation2 + $0x380] sm:$0xff] }
0x1ab0   :  { %2843 = vmatpush1.bf16.msra.mxu0 %v2842_v36  ;;  %v2920_v36 = vpack.c.bf16 %v1731_v26, %v1730_v25  ;;  %v1385_v25 = vld [vmem:[#allocation2 + $0x3b0] sm:$0xff]  ;;  %v1392_v26 = vld [vmem:[#allocation2 + $0x3e8] sm:$0xff] }
0x1ab1   :  { %2909 = vmatprep.subr.bf16.mxu0 %v2908_v54  ;;  %v2922_v54 = vpack.c.bf16 %v1715_v44, %v1714_v41  ;;  %v1403_v44 = vld [vmem:[#allocation2 + $0x440] sm:$0xff] }
0x1af0   :  { %v1238_v46 = vpop.permute.xlu0 %1237 }
0x1af1   :  { %v1240_v47 = vadd.f32 %v3477_v55, %v1238_v46  ;;  %v1259_v55 = vsel %vm289_vm3, %v3360_v11, %v3019_v57  ;;  %v1733_v46 = vld [vmem:[%s3850_s10 + $0xc8] sm:$0xff] }
0x1af2   :  { %v1261_v53 = vsel %vm1260_vm4, %v1259_v55, %v700_v63  ;;  %v1728_v63 = vld [vmem:[%s3850_s10 + $0xa0] sm:$0xff]  ;;  %v2924_v57 = vpack.c.bf16 %v1733_v46, %v1732_v45  ;;  %v1717_v55 = vld [vmem:[%s3850_s10 + $0x48] sm:$0xff]  ;;  %v1409_v45 = vld [vmem:[#allocation2 + $0x470] sm:$0xff] }
0x1af3   :  { %v1255_v48 = vrot.slane %v1240_v47, 6  ;;  %v2916_v21 = vpack.c.bf16 %v1729_v40, %v1728_v63  ;;  %v2858_v47 = vpack.c.bf16 %v1313_v30, %v1307_v29  ;;  %v2926_v2 = vpack.c.bf16 %v1717_v55, %v1716_v58  ;;  %v1361_v63 = vld [vmem:[#allocation2 + $0x2f0] sm:$0xff]  ;;  %v1368_v40 = vld [vmem:[#allocation2 + $0x328] sm:$0xff]  ;;  %v1391_v30 = vld [vmem:[#allocation2 + $0x3e0] sm:$0xff] }
0x1af4   :  { %v1416_v46 = vld [vmem:[#allocation2 + $0x4a8] sm:$0xff]  ;;  %v1427_v55 = vld [vmem:[#allocation2 + $0x500] sm:$0xff] }
0x1af5   :  { %v3020_v49 = vpack.i.bf16 %v809_v23, %v1255_v48  ;;  %v1271_v23 = vld [vmem:[#allocation2 + $0x20] sm:$0xff]  ;;  %v2860_v48 = vpack.c.bf16 %v1326_v35, %v1320_v31  ;;  %v1397_v31 = vld [vmem:[#allocation2 + $0x410] sm:$0xff]  ;;  %v1410_v35 = vld [vmem:[#allocation2 + $0x478] sm:$0xff] }
0x1af6   :  { %v2846_v5 = vpack.c.bf16 %v1277_v60, %v1271_v23  ;;  %v1735_v23 = vld [vmem:[%s3850_s10 + $0xd8] sm:$0xff] }
0x1af7   :  { %3021 = vrot.lane.b32.xlu0 %v3020_v49, %s3123_s7  ;;  %v1319_v49 = vld [vmem:[#allocation2 + $0x1a0] sm:$0xff] }
0x1af8   :  { %v2862_v60 = vpack.c.bf16 %v1325_v51, %v1319_v49  ;;  %v1415_v51 = vld [vmem:[#allocation2 + $0x4a0] sm:$0xff] }
0x1b69   :  { %v3022_v61 = vpop.permute.xlu0 %3021 }
0x1b6a   :  { %v3024_v42 = vunpack.i.h.bf16 %v3022_v61  ;;  %v3023_v11 = vunpack.i.l.bf16 %v3022_v61  ;;  %v1331_v61 = vld [vmem:[#allocation2 + $0x200] sm:$0xff] }
0x1b6c   :  { %v1266_v6 = vsel %vm1262_vm5, %v1265_v4, %v3023_v11  ;;  %v3516_v7 = vsel %vm1262_vm5, %v1261_v53, %v3024_v42  ;;  %v1350_v42 = vld [vmem:[#allocation2 + $0x298] sm:$0xff]  ;;  %v2928_v11 = vpack.c.bf16 %v1735_v23, %v1734_v22  ;;  %v1736_v4 = vld [vmem:[%s3850_s10 + $0xe0] sm:$0xff]  ;;  %v1737_v53 = vld [vmem:[%s3850_s10 + $0xe8] sm:$0xff] }
0x1b6d   :  { %1555 = vmatprep.mubr.f32.mxu1 %v1266_v6  ;;  %1626 = vmatprep.mubr.f32.mxu0 %v1266_v6  ;;  %v2932_v15 = vpack.c.bf16 %v1737_v53, %v1736_v4  ;;  %v1433_v22 = vld [vmem:[#allocation2 + $0x530] sm:$0xff]  ;;  %v1440_v23 = vld [vmem:[#allocation2 + $0x568] sm:$0xff] }
0x1b6e   :  { %1556 = vmatmul.mubr.f32.vlgmr.msra.gmra.mrb[14].mxu1 %v3516_v7  ;;  %1627 = vmatmul.mubr.f32.vlgmr.msra.gmra.mrb[8].mxu0 %v3516_v7  ;;  %v1457_v4 = vld [vmem:[#allocation2 + $0x5f0] sm:$0xff] }
0x1b6f   :  { %2847 = vmatpush1.bf16.msra.mxu1 %v2846_v5  ;;  %1697 = vmatprep.mubr.f32.mxu1 %v1266_v6  ;;  %v2866_v5 = vpack.c.bf16 %v1337_v0, %v1331_v61  ;;  %v2868_v6 = vpack.c.bf16 %v1350_v42, %v1344_v1  ;;  %v1439_v0 = vld [vmem:[#allocation2 + $0x560] sm:$0xff]  ;;  %v1445_v1 = vld [vmem:[#allocation2 + $0x590] sm:$0xff]  ;;  %v1458_v42 = vld [vmem:[#allocation2 + $0x5f8] sm:$0xff]  ;;  %v2906_v53 = vpack.c.bf16 %v1457_v4, %v1451_v3 }
0x1b70   :  { %2849 = vmatprep.subr.bf16.mxu1 %v2848_v8  ;;  %2911 = vmatpush3.bf16.msra.mxu0 %v2910_v14  ;;  %v1343_v8 = vld [vmem:[#allocation2 + $0x260] sm:$0xff]  ;;  %v1362_v14 = vld [vmem:[#allocation2 + $0x2f8] sm:$0xff]  ;;  %v1750_v4 = vld [vmem:[%s3850_s10 + $0x150] sm:$0xff] }
0x1b71   :  { %2913 = vmatprep.subr.bf16.mxu0 %v2912_v16  ;;  %v2870_v16 = vpack.c.bf16 %v1349_v9, %v1343_v8  ;;  %v2872_v37 = vpack.c.bf16 %v1362_v14, %v1356_v13  ;;  %v1738_v9 = vld [vmem:[%s3850_s10 + $0xf0] sm:$0xff]  ;;  %v1723_v14 = vld [vmem:[%s3850_s10 + $0x78] sm:$0xff] }
0x1b72   :  { %v1722_v13 = vld [vmem:[%s3850_s10 + $0x70] sm:$0xff] }
0x1b73   :  { %2851 = vmatpush1.bf16.msra.mxu1 %v2850_v32  ;;  %v1374_v32 = vld [vmem:[#allocation2 + $0x358] sm:$0xff] }
0x1b74   :  { %2853 = vmatprep.subr.bf16.mxu1 %v2852_v33  ;;  %2915 = vmatpush3.bf16.msra.mxu0 %v2914_v19  ;;  %v2874_v33 = vpack.c.bf16 %v1361_v63, %v1355_v62  ;;  %v2876_v12 = vpack.c.bf16 %v1374_v32, %v1368_v40  ;;  %v1380_v19 = vld [vmem:[#allocation2 + $0x388] sm:$0xff]  ;;  %v1461_v63 = vlaneseq }
0x1b75   :  { %2917 = vmatprep.subr.bf16.mxu0 %v2916_v21  ;;  %v2878_v21 = vpack.c.bf16 %v1373_v18, %v1367_v17  ;;  %v2880_v59 = vpack.c.bf16 %v1386_v20, %v1380_v19 }
0x1b76   :  { %v3608_v40 = vshrl.u32 %v1461_v63, 7 }
0x1b77   :  { %2855 = vmatpush1.bf16.msra.mxu1 %v2854_v27  ;;  %v1398_v27 = vld [vmem:[#allocation2 + $0x418] sm:$0xff] }
0x1b78   :  { %2857 = vmatprep.subr.bf16.mxu1 %v2856_v28  ;;  %2919 = vmatpush3.bf16.msra.mxu0 %v2918_v34  ;;  %v2882_v28 = vpack.c.bf16 %v1385_v25, %v1379_v24  ;;  %v2884_v29 = vpack.c.bf16 %v1398_v27, %v1392_v26  ;;  %v1404_v34 = vld [vmem:[#allocation2 + $0x448] sm:$0xff]  ;;  %v1463_v32 = vsub.s32 0, %v3608_v40  ;;  %v1475_v17 = vsub.s32 3, %v3608_v40 }
0x1b79   :  { %2921 = vmatprep.subr.bf16.mxu0 %v2920_v36  ;;  %v2886_v36 = vpack.c.bf16 %v1397_v31, %v1391_v30  ;;  %v2888_v41 = vpack.c.bf16 %v1410_v35, %v1404_v34  ;;  %v1758_v31 = vld [vmem:[%s3850_s10 + $0x190] sm:$0xff]  ;;  %v1759_v34 = vld [vmem:[%s3850_s10 + $0x198] sm:$0xff] }
0x1b7b   :  { %2859 = vmatpush1.bf16.msra.mxu1 %v2858_v47  ;;  %v1422_v47 = vld [vmem:[#allocation2 + $0x4d8] sm:$0xff] }
0x1b7c   :  { %2861 = vmatprep.subr.bf16.mxu1 %v2860_v48  ;;  %2923 = vmatpush3.bf16.msra.mxu0 %v2922_v54  ;;  %v2890_v48 = vpack.c.bf16 %v1409_v45, %v1403_v44  ;;  %v2892_v49 = vpack.c.bf16 %v1422_v47, %v1416_v46  ;;  %v1428_v54 = vld [vmem:[#allocation2 + $0x508] sm:$0xff]  ;;  %v2944_v44 = vpack.c.bf16 %v1759_v34, %v1758_v31  ;;  %v1742_v45 = vld [vmem:[%s3850_s10 + $0x110] sm:$0xff]  ;;  %v1743_v46 = vld [vmem:[%s3850_s10 + $0x118] sm:$0xff] }
0x1b7d   :  { %2925 = vmatprep.subr.bf16.mxu0 %v2924_v57  ;;  %v2894_v57 = vpack.c.bf16 %v1421_v52, %v1415_v51  ;;  %v2896_v58 = vpack.c.bf16 %v1434_v56, %v1428_v54  ;;  %v1760_v47 = vld [vmem:[%s3850_s10 + $0x1a0] sm:$0xff]  ;;  %v1745_v54 = vld [vmem:[%s3850_s10 + $0x128] sm:$0xff]  ;;  %v1762_v56 = vld [vmem:[%s3850_s10 + $0x1b0] sm:$0xff] }
0x1b7e   :  { %v1744_v52 = vld [vmem:[%s3850_s10 + $0x120] sm:$0xff] }
0x1b7f   :  { %2863 = vmatpush1.bf16.msra.mxu1 %v2862_v60  ;;  %v1446_v60 = vld [vmem:[#allocation2 + $0x598] sm:$0xff] }
0x1b80   :  { %2865 = vmatprep.subr.bf16.mxu1 %v2864_v38  ;;  %2927 = vmatpush3.bf16.msra.mxu0 %v2926_v2  ;;  %v2898_v38 = vpack.c.bf16 %v1433_v22, %v1427_v55  ;;  %v2900_v61 = vpack.c.bf16 %v1446_v60, %v1440_v23  ;;  %v1452_v2 = vld [vmem:[#allocation2 + $0x5c8] sm:$0xff]  ;;  %v1746_v22 = vld [vmem:[%s3850_s10 + $0x130] sm:$0xff]  ;;  %v1747_v23 = vld [vmem:[%s3850_s10 + $0x138] sm:$0xff] }
0x1b81   :  { %2929 = vmatprep.subr.bf16.mxu0 %v2928_v11  ;;  %v2902_v11 = vpack.c.bf16 %v1445_v1, %v1439_v0  ;;  %v2904_v50 = vpack.c.bf16 %v1458_v42, %v1452_v2  ;;  %v1764_v60 = vld [vmem:[%s3850_s10 + $0x1c0] sm:$0xff]  ;;  %v1749_v2 = vld [vmem:[%s3850_s10 + $0x148] sm:$0xff]  ;;  %v1766_v42 = vld [vmem:[%s3850_s10 + $0x1d0] sm:$0xff] }
0x1b82   :  { %v1748_v1 = vld [vmem:[%s3850_s10 + $0x140] sm:$0xff] }
0x1b83   :  { %2867 = vmatpush1.bf16.msra.mxu1 %v2866_v5  ;;  %v1720_v5 = vld [vmem:[%s3850_s10 + $0x60] sm:$0xff] }
0x1b84   :  { %2869 = vmatprep.subr.bf16.mxu1 %v2868_v6  ;;  %2931 = vmatpush3.bf16.msra.mxu0 %v2930_v10  ;;  %v1721_v6 = vld [vmem:[%s3850_s10 + $0x68] sm:$0xff] }
0x1b85   :  { %2933 = vmatprep.subr.bf16.mxu0 %v2932_v15  ;;  %v2934_v8 = vpack.c.bf16 %v1721_v6, %v1720_v5  ;;  %v2938_v15 = vpack.c.bf16 %v1723_v14, %v1722_v13  ;;  %v1768_v5 = vld [vmem:[%s3850_s10 + $0x1e0] sm:$0xff]  ;;  %v1769_v6 = vld [vmem:[%s3850_s10 + $0x1e8] sm:$0xff]  ;;  %v1770_v13 = vld [vmem:[%s3850_s10 + $0x1f0] sm:$0xff] }
0x1b86   :  { %v1771_v14 = vld [vmem:[%s3850_s10 + $0x1f8] sm:$0xff] }
0x1b87   :  { %2871 = vmatpush1.bf16.msra.mxu1 %v2870_v16  ;;  %v1756_v16 = vld [vmem:[%s3850_s10 + $0x180] sm:$0xff] }
0x1b88   :  { %2873 = vmatprep.subr.bf16.mxu1 %v2872_v37  ;;  %2935 = vmatpush3.bf16.msra.mxu0 %v2934_v8  ;;  %v1757_v37 = vld [vmem:[%s3850_s10 + $0x188] sm:$0xff] }
0x1b89   :  { %v2940_v62 = vpack.c.bf16 %v1757_v37, %v1756_v16  ;;  %v2968_v16 = vpack.c.bf16 %v1771_v14, %v1770_v13  ;;  %v1754_v37 = vld [vmem:[%s3850_s10 + $0x170] sm:$0xff]  ;;  %v2039_v13 = vld [vmem:[%s3852_s12 + $0x58] sm:$0xff] }
0x1b8b   :  { %2875 = vmatpush1.bf16.msra.mxu1 %v2874_v33  ;;  %v1471_v33 = vsub.s32 2, %v3608_v40 }
0x1b8c   :  { %2877 = vmatprep.subr.bf16.mxu1 %v2876_v12  ;;  %v3615_v12 = vld [vmem:[%s3849_s9] sm:$0x3f] }
0x1b8d   :  { %v1464_v18 = vrot.slane %v3615_v12, %v1463_v32  ;;  %v1472_v19 = vrot.slane %v3615_v12, %v1471_v33  ;;  %v1476_v20 = vrot.slane %v3615_v12, %v1475_v17  ;;  %v1479_v32 = vsub.s32 4, %v3608_v40 }
0x1b8e   :  { %v1483_v33 = vsub.s32 5, %v3608_v40 }
0x1b8f   :  { %2879 = vmatpush1.bf16.msra.mxu1 %v2878_v21  ;;  %v1480_v17 = vrot.slane %v3615_v12, %v1479_v32 }
0x1b90   :  { %2881 = vmatprep.subr.bf16.mxu1 %v2880_v59 }
0x1b93   :  { %2883 = vmatpush1.bf16.msra.mxu1 %v2882_v28  ;;  %v1740_v28 = vld [vmem:[%s3850_s10 + $0x100] sm:$0xff] }
0x1b94   :  { %2885 = vmatprep.subr.bf16.mxu1 %v2884_v29  ;;  %v1741_v29 = vld [vmem:[%s3850_s10 + $0x108] sm:$0xff] }
0x1b97   :  { %2887 = vmatpush1.bf16.msra.mxu1 %v2886_v36  ;;  %v2942_v36 = vpack.c.bf16 %v1741_v29, %v1740_v28 }
0x1b98   :  { %2889 = vmatprep.subr.bf16.mxu1 %v2888_v41 }
0x1b9b   :  { %2891 = vmatpush1.bf16.msra.mxu1 %v2890_v48  ;;  %v1761_v48 = vld [vmem:[%s3850_s10 + $0x1a8] sm:$0xff] }
0x1b9c   :  { %2893 = vmatprep.subr.bf16.mxu1 %v2892_v49  ;;  %v2946_v49 = vpack.c.bf16 %v1743_v46, %v1742_v45  ;;  %v2948_v51 = vpack.c.bf16 %v1761_v48, %v1760_v47 }
0x1b9f   :  { %2895 = vmatpush1.bf16.msra.mxu1 %v2894_v57  ;;  %v1763_v57 = vld [vmem:[%s3850_s10 + $0x1b8] sm:$0xff] }
0x1ba0   :  { %2897 = vmatprep.subr.bf16.mxu1 %v2896_v58  ;;  %v2950_v58 = vpack.c.bf16 %v1745_v54, %v1744_v52  ;;  %v2952_v55 = vpack.c.bf16 %v1763_v57, %v1762_v56 }
0x1ba3   :  { %2899 = vmatpush1.bf16.msra.mxu1 %v2898_v38  ;;  %v1765_v38 = vld [vmem:[%s3850_s10 + $0x1c8] sm:$0xff] }
0x1ba4   :  { %2901 = vmatprep.subr.bf16.mxu1 %v2900_v61  ;;  %v2954_v61 = vpack.c.bf16 %v1747_v23, %v1746_v22  ;;  %v2956_v0 = vpack.c.bf16 %v1765_v38, %v1764_v60  ;;  %v1943_v22 = vld [vmem:[%s3851_s11] sm:$0xff]  ;;  %v2029_v38 = vld [vmem:[%s3852_s12 + $0x8] sm:$0xff] }
0x1ba5   :  { %v2028_v60 = vld [vmem:[%s3852_s12] sm:$0xff] }
0x1ba7   :  { %2903 = vmatpush1.bf16.msra.mxu1 %v2902_v11  ;;  %v1767_v11 = vld [vmem:[%s3850_s10 + $0x1d8] sm:$0xff] }
0x1ba8   :  { %2905 = vmatprep.subr.bf16.mxu1 %v2904_v50  ;;  %v2958_v50 = vpack.c.bf16 %v1749_v2, %v1748_v1  ;;  %v2960_v3 = vpack.c.bf16 %v1767_v11, %v1766_v42  ;;  %v2031_v1 = vld [vmem:[%s3852_s12 + $0x18] sm:$0xff]  ;;  %v2032_v42 = vld [vmem:[%s3852_s12 + $0x20] sm:$0xff]  ;;  %v2033_v11 = vld [vmem:[%s3852_s12 + $0x28] sm:$0xff] }
0x1bab   :  { %2907 = vmatpush1.bf16.msra.mxu1 %v2906_v53  ;;  %v1751_v53 = vld [vmem:[%s3850_s10 + $0x158] sm:$0xff] }
0x1bac   :  { %2601 = vmatprep.subr.mxu1 %v3120_v43  ;;  %v2962_v8 = vpack.c.bf16 %v1751_v53, %v1750_v4  ;;  %v2035_v4 = vld [vmem:[%s3852_s12 + $0x38] sm:$0xff] }
0x1bae   :  { %1698 = vmatmul.mubr.f32.vlgmr.msra.gmra.mrb[16].mxu1 %v3516_v7  ;;  %v1739_v7 = vld [vmem:[%s3850_s10 + $0xf8] sm:$0xff] }
0x1baf   :  { %2603 = vmatprep.mubr.msk.f32.mxu1 %vm3119_vm2, %v3120_v43  ;;  %v2936_v10 = vpack.c.bf16 %v1739_v7, %v1738_v9  ;;  %v2964_v9 = vpack.c.bf16 %v1769_v6, %v1768_v5  ;;  %v1752_v7 = vld [vmem:[%s3850_s10 + $0x160] sm:$0xff]  ;;  %2602 = vmatpush3.msra.mxu1 %v1943_v22 }
0x1bb0   :  { %2996 = vmatprep.subr.bf16.mxu1 %v3118_v39 }
0x1bb1   :  { %2937 = vmatprep.subr.bf16.mxu0 %v2936_v10  ;;  %v1753_v10 = vld [vmem:[%s3850_s10 + $0x168] sm:$0xff] }
0x1bb2   :  { %2939 = vmatpush3.bf16.msra.mxu0 %v2938_v15  ;;  %v2966_v15 = vpack.c.bf16 %v1753_v10, %v1752_v7  ;;  %v2038_v10 = vld [vmem:[%s3852_s12 + $0x50] sm:$0xff] }
0x1bb3   :  { %2941 = vmatprep.subr.bf16.mxu0 %v2940_v62  ;;  %v1755_v62 = vld [vmem:[%s3850_s10 + $0x178] sm:$0xff]  ;;  %s3124_s10 = smov 112   ;;  %v2988_v14 = vpack.c.bf16 %v2039_v13, %v2038_v10 }
0x1bb4   :  { %v2970_v63 = vpack.c.bf16 %v1755_v62, %v1754_v37  ;;  %v2042_v62 = vld [vmem:[%s3852_s12 + $0x70] sm:$0xff] }
0x1c41   :  { %v1557_v21 = vpop.f32.mrb[14].mxu1  ;;  %v1628_v59 = vpop.f32.mrb[8].mxu0 }
0x1c42   :  { %v3621_v24 = vadd.f32 %v1557_v21, %v1464_v18  ;;  %v1629_v25 = vadd.f32 %v1628_v59, %v1472_v19  ;;  %v3623_v26 = vpop.f32.mrb[15].mxu1  ;;  %v1630_v27 = vpop.f32.mrb[9].mxu0  ;;  %v1484_v18 = vrot.slane %v3615_v12, %v1483_v33  ;;  %v2115_v33 = vld [vmem:[%s3853_s13] sm:$0xff] }
0x1c43   :  { %v1631_v30 = vadd.f32 %v1630_v27, %v1476_v20 }
0x1c44   :  { %v1704_v41 = vmul.f32 %v1629_v25, %v3621_v24 }
0x1c45   :  { %v1705_v35 = vmul.f32 %v1631_v30, %v3621_v24 }
0x1c47   :  { %1836 = vmatprep.mubr.f32.mxu0 %v1705_v35 }
0x1c48   :  { %1837 = vmatmul.mubr.f32.vlgmr.msra.gmra.mrb[10].mxu0 %v1704_v41 }
0x1c49   :  { %2943 = vmatpush3.bf16.msra.mxu0 %v2942_v36 }
0x1c4a   :  { %2945 = vmatprep.subr.bf16.mxu0 %v2944_v44 }
0x1c4d   :  { %2947 = vmatpush3.bf16.msra.mxu0 %v2946_v49 }
0x1c4e   :  { %2949 = vmatprep.subr.bf16.mxu0 %v2948_v51 }
0x1c51   :  { %2951 = vmatpush3.bf16.msra.mxu0 %v2950_v58 }
0x1c52   :  { %2953 = vmatprep.subr.bf16.mxu0 %v2952_v55 }
0x1c55   :  { %2955 = vmatpush3.bf16.msra.mxu0 %v2954_v61  ;;  %v2030_v61 = vld [vmem:[%s3852_s12 + $0x10] sm:$0xff] }
0x1c56   :  { %2957 = vmatprep.subr.bf16.mxu0 %v2956_v0  ;;  %v2973_v0 = vpack.c.bf16 %v2029_v38, %v2028_v60  ;;  %v2976_v2 = vpack.c.bf16 %v2031_v1, %v2030_v61  ;;  %v2331_v60 = vld [vmem:[%s3855_s15] ss:$0 sm:$0xff]  ;;  %s3128_s15 = smov 24  }
0x1c59   :  { %2959 = vmatpush3.bf16.msra.mxu0 %v2958_v50  ;;  %v2979_v50 = vpack.c.bf16 %v2033_v11, %v2032_v42 }
0x1c5a   :  { %2961 = vmatprep.subr.bf16.mxu0 %v2960_v3  ;;  %v2034_v3 = vld [vmem:[%s3852_s12 + $0x30] sm:$0xff] }
0x1c5b   :  { %v2982_v6 = vpack.c.bf16 %v2035_v4, %v2034_v3 }
0x1c5d   :  { %2963 = vmatpush3.bf16.msra.mxu0 %v2962_v8  ;;  %v2036_v8 = vld [vmem:[%s3852_s12 + $0x40] sm:$0xff] }
0x1c5e   :  { %2965 = vmatprep.subr.bf16.mxu0 %v2964_v9  ;;  %v2037_v9 = vld [vmem:[%s3852_s12 + $0x48] sm:$0xff] }
0x1c5f   :  { %v2985_v7 = vpack.c.bf16 %v2037_v9, %v2036_v8 }
0x1c61   :  { %2967 = vmatpush3.bf16.msra.mxu0 %v2966_v15  ;;  %v2040_v15 = vld [vmem:[%s3852_s12 + $0x60] sm:$0xff] }
0x1c62   :  { %2969 = vmatprep.subr.bf16.mxu0 %v2968_v16  ;;  %v2041_v16 = vld [vmem:[%s3852_s12 + $0x68] sm:$0xff] }
0x1c63   :  { %v2991_v37 = vpack.c.bf16 %v2041_v16, %v2040_v15 }
0x1c65   :  { %2971 = vmatpush3.bf16.msra.mxu0 %v2970_v63  ;;  %v2043_v63 = vld [vmem:[%s3852_s12 + $0x78] sm:$0xff] }
0x1c66   :  { %2972 = vmatprep.subr.bf16.mxu0 %v3118_v39  ;;  %v2994_v32 = vpack.c.bf16 %v2043_v63, %v2042_v62 }
0x1c81   :  { %v1699_v19 = vpop.f32.mrb[16].mxu1 }
0x1c82   :  { %v1700_v20 = vadd.f32 %v1699_v19, %v1480_v17  ;;  %v1701_v21 = vpop.f32.mrb[17].mxu1  ;;  %v2116_v17 = vld [vmem:[%s3853_s13 + $0x8] sm:$0xff] }
0x1c83   :  { %v1702_v59 = vadd.f32 %v1701_v21, %v1484_v18  ;;  %v2997_v18 = vpack.c.bf16 %v2116_v17, %v2115_v33 }
0x1c84   :  { %v1706_v27 = vmul.f32 %v1700_v20, %v3621_v24 }
0x1c85   :  { %v1707_v25 = vmul.f32 %v1702_v59, %v3621_v24 }
0x1c87   :  { %1906 = vmatprep.mubr.f32.mxu0 %v1707_v25 }
0x1c88   :  { %1907 = vmatmul.mubr.f32.vlgmr.msra.gmra.mrb[12].mxu0 %v1706_v27 }
0x1c89   :  { %2638 = vmatprep.mubr.msk.f32.mxu0 %vm3119_vm2, %v3120_v43  ;;  %2974 = vmatpush3.bf16.msra.mxu0 %v2973_v0  ;;  %v2332_v0 = vld [vmem:[%s3856_s16] ss:$0 sm:$0xff]  ;;  %s3129_s16 = smov 16  }
0x1c8a   :  { %2975 = vmatprep.subr.bf16.mxu0 %v3118_v39 }
0x1c8d   :  { %2977 = vmatpush3.bf16.msra.mxu0 %v2976_v2 }
0x1c8e   :  { %2978 = vmatprep.subr.bf16.mxu0 %v3118_v39 }
0x1c91   :  { %2980 = vmatpush3.bf16.msra.mxu0 %v2979_v50 }
0x1c92   :  { %2981 = vmatprep.subr.bf16.mxu0 %v3118_v39 }
0x1c95   :  { %2983 = vmatpush3.bf16.msra.mxu0 %v2982_v6 }
0x1c96   :  { %2984 = vmatprep.subr.bf16.mxu0 %v3118_v39 }
0x1c99   :  { %2986 = vmatpush3.bf16.msra.mxu0 %v2985_v7 }
0x1c9a   :  { %2987 = vmatprep.subr.bf16.mxu0 %v3118_v39 }
0x1c9d   :  { %2989 = vmatpush3.bf16.msra.mxu0 %v2988_v14 }
0x1c9e   :  { %2990 = vmatprep.subr.bf16.mxu0 %v3118_v39 }
0x1ca1   :  { %2992 = vmatpush3.bf16.msra.mxu0 %v2991_v37 }
0x1ca2   :  { %2993 = vmatprep.subr.bf16.mxu0 %v3118_v39  ;;  %v1467_v39 = vsub.s32 1, %v3608_v40 }
0x1ca4   :  { %v1468_v19 = vrot.slane %v3615_v12, %v1467_v39  ;;  %v2329_v12 = vld [vmem:[%s3854_s14] ss:$0 sm:$0xff] }
0x1ca5   :  { %2995 = vmatpush3.bf16.msra.mxu0 %v2994_v32 }
0x1ca6   :  { %v1560_v20 = vadd.f32 %v3623_v26, %v1468_v19 }
0x1ca8   :  { %v2018_v21 = vrot.slane %v1560_v20, 6  ;;  %v2020_v59 = vrot.slane %v1560_v20, 4 }
0x1caa   :  { %v2024_v25 = vsel %vm1925_vm6, %v1560_v20, %v2018_v21 }
0x1cab   :  { %v2025_v27 = vsel %vm1927_vm7, %v2024_v25, %v2020_v59 }
0x1d1b   :  { %v2422_v28 = vpop.f32.mrb[10].mxu0 }
0x1d1c   :  { %v2423_v29 = vpop.f32.mrb[11].mxu0 }
0x1d1d   :  { %v2424_v30 = vadd.f32 %v2423_v29, %v2422_v28  ;;  %v2022_v28 = vrot.slane %v1560_v20, 2 }
0x1d5b   :  { %v2457_v31 = vpop.f32.mrb[12].mxu0 }
0x1d5c   :  { %v2458_v34 = vpop.f32.mrb[13].mxu0 }
0x1d5d   :  { %v2459_v35 = vadd.f32 %v2458_v34, %v2457_v31 }
0x1d5f   :  { %v1909_v36 = vadd.f32 %v2459_v35, %v2424_v30  ;;  %v2026_v30 = vsel %vm1929_vm9, %v2025_v27, %v2022_v28 }
0x1d61   :  { %v1917_v41 = vrot.slane %v1909_v36, 4  ;;  %v1913_v44 = vrot.slane %v1909_v36, 6  ;;  %v1921_v45 = vrot.slane %v1909_v36, 2 }
0x1d63   :  { %1918 = vrot.lane.b32.xlu0 %v1917_v41, %s3124_s10  ;;  %1914 = vrot.lane.b32.xlu1 %v1913_v44, %s3125_s0  ;;  %s3127_s10 = smov 8  }
0x1d67   :  { %1922 = vrot.lane.b32.xlu1 %v1921_v45, %s3126_s30 }
0x1dd5   :  { %v1915_v24 = vpop.permute.xlu1 %1914  ;;  %v1919_v46 = vpop.permute.xlu0 %1918 }
0x1dd6   :  { %v1926_v47 = vsel %vm1925_vm6, %v1909_v36, %v1915_v24 }
0x1dd7   :  { %v1928_v48 = vsel %vm1927_vm7, %v1926_v47, %v1919_v46 }
0x1dd9   :  { %v1923_v49 = vpop.permute.xlu1 %1922 }
0x1dda   :  { %v3729_v51 = vsel %vm1929_vm9, %v1928_v48, %v1923_v49 }
0x1ddb   :  { %v1932_v52 = vsel %vm1931_vm8, %v3729_v51, -inf }
0x1ddc   :  { %1933 = vmax.xlane.f32.xlu0 %v1932_v52 }
0x1e69   :  { %v1934_v54 = vpop.xlane.xlu0 %1933 }
0x1e6a   :  { %v1935_v56 = vsub.f32 %v3729_v51, %v1934_v54 }
0x1e6c   :  { %v1936_v57 = vmul.f32 1.442695, %v1935_v56 }
0x1e6e   :  { %3057 = vpow2.f32 %v1936_v57 }
0x1e78   :  { %v3058_v58 = vpop.eup %3057 }
0x1e79   :  { %v1938_v55 = vsel %vm1931_vm8, %v3058_v58, 0.0 }
0x1e7a   :  { %1939 = vadd.xlane.f32.xlu1 %v1938_v55 }
0x1f07   :  { %v1940_v23 = vpop.xlane.xlu1 %1939 }
0x1f08   :  { %3059 = vrcp.f32 %v1940_v23 }
0x1f12   :  { %v3060_v53 = vpop.eup %3059 }
0x1f13   :  { %v1942_v5 = vmul.f32 %v3060_v53, %v3058_v58 }
0x1f15   :  { %2271 = vrot.lane.b32.xlu1 %v1942_v5, %s3127_s10  ;;  %2604 = vmatmul.mubr.msk.f32.vlgmr.msra.gmra.mrb[18].mxu1 %vm1931_vm8, %v1942_v5 }
0x1f16   :  { %2645 = vmatprep.mubr.msk.f32.mxu1 %vm3119_vm2, %v3120_v43  ;;  %2998 = vmatpush3.bf16.msra.mxu1 %v2997_v18 }
0x1f87   :  { %v2272_v63 = vpop.permute.xlu1 %2271 }
0x1f88   :  { %v2282_v32 = vsel %vm1931_vm8, %v3729_v51, %v2272_v63 }
0x1fe8   :  { %v2013_v29 = vpop.f32.mrb[18].mxu1 }
0x1fe9   :  { %v2027_v31 = vmul.f32 %v2026_v30, %v2013_v29  ;;  %v2605_v34 = vpop.f32.mrb[19].mxu1 }
0x1feb   :  { %2639 = vmatmul.mubr.f32.vlgmr.msra.gmra.mrb[14].mxu0 %v2027_v31 }
0x20be   :  { %v2110_v35 = vpop.f32.mrb[14].mxu0 }
0x20bf   :  { %v2114_v36 = vmax.f32 %v2110_v35, 0.0  ;;  %v2640_v40 = vpop.f32.mrb[15].mxu0 }
0x20c1   :  { %2646 = vmatmul.mubr.msk.f32.vlgmr.msra.gmra.mrb[20].mxu1 %vm100_vm0, %v2114_v36 }
0x2194   :  { %v2193_v26 = vpop.f32.mrb[20].mxu1 }
0x2195   :  { %v2194_v41 = vadd.f32 %v2329_v12, %v2193_v26  ;;  %v2647_v44 = vpop.f32.mrb[21].mxu1 }
0x2197   :  { %v2197_v45 = vsel %vm1931_vm8, %v2194_v41, 0.0 }
0x2198   :  { %2198 = vadd.xlane.f32.xlu0 %v2197_v45 }
0x2225   :  { %v2199_v24 = vpop.xlane.xlu0 %2198 }
0x2226   :  { %v2201_v46 = vmul.f32 0.125, %v2199_v24 }
0x2228   :  { %v2202_v47 = vsub.f32 %v2194_v41, %v2201_v46 }
0x222a   :  { %v2203_v48 = vmul.f32 %v2202_v47, %v2202_v47  ;;  %v2223_v38 = vmul.f32 %v2331_v60, %v2202_v47 }
0x222c   :  { %v2204_v49 = vsel %vm1931_vm8, %v2203_v48, 0.0 }
0x222d   :  { %2205 = vadd.xlane.f32.xlu0 %v2204_v49 }
0x22ba   :  { %v2206_v52 = vpop.xlane.xlu0 %2205 }
0x22bb   :  { %v2208_v54 = vmul.f32 0.14285715, %v2206_v52 }
0x22bd   :  { %3061 = vrsqrt.f32 %v2208_v54  ;;  %vm2211_vm10 = vcmp.eq.f32.partialorder %v2208_v54, inf  ;;  %v2214_v58 = vand.u32 2147483648, %v2208_v54  ;;  %vm2213_vm11 = vcmp.eq.f32.partialorder %v2208_v54, 0.0 }
0x22c7   :  { %v3062_v56 = vpop.eup %3061 }
0x22c8   :  { %v2210_v57 = vmul.f32 %v3062_v56, %v2208_v54 }
0x22ca   :  { %v2212_v55 = vsel %vm2211_vm10, %v2208_v54, %v2210_v57 }
0x22cb   :  { %v2215_v22 = vsel %vm2213_vm11, %v2214_v58, %v2212_v55 }
0x22cc   :  { %v2224_v23 = vadd.f32 1e-06, %v2215_v22 }
0x22ce   :  { %3063 = vrcp.f32 %v2224_v23 }
0x22d8   :  { %v3064_v61 = vpop.eup %3063 }
0x22d9   :  { %v2226_v1 = vmul.f32 %v3064_v61, %v2223_v38 }
0x22db   :  { %v2234_v2 = vadd.f32 %v2332_v0, %v2226_v1 }
0x22dd   :  { %v2236_v42 = vrot.slane %v2234_v2, 6 }
0x22df   :  { %vm2238_vm12 = vcmp.gt.f32.partialorder %v2234_v2, %v2236_v42 }
0x22e0   :  { %v2239_v11 = vsel %vm2238_vm12, 1.0, %v3120_v43  ;;  %v2240_v50 = vsel %vm2238_vm12, %v2234_v2, %v2236_v42 }
0x22e1   :  { %v2242_v3 = vrot.slane %v2240_v50, 6  ;;  %v2246_v4 = vrot.slane %v2239_v11, 6 }
0x22e3   :  { %vm2244_vm13 = vcmp.gt.f32.partialorder %v2234_v2, %v2242_v3 }
0x22e4   :  { %v2248_v53 = vsel %vm2244_vm13, 2.0, %v2246_v4  ;;  %v2249_v5 = vsel %vm2244_vm13, %v2234_v2, %v2242_v3 }
0x22e5   :  { %v2251_v6 = vrot.slane %v2249_v5, 6  ;;  %v2255_v8 = vrot.slane %v2248_v53, 6 }
0x22e7   :  { %vm2253_vm14 = vcmp.gt.f32.partialorder %v2234_v2, %v2251_v6 }
0x22e8   :  { %v2257_v9 = vsel %vm2253_vm14, 3.0, %v2255_v8  ;;  %v2258_v7 = vsel %vm2253_vm14, %v2234_v2, %v2251_v6 }
0x22e9   :  { %v2259_v10 = vmul.f32 0.5, %v2258_v7  ;;  %v2268_v13 = vrot.slane %v2257_v9, 6 }
0x22eb   :  { %v2270_v14 = vsel %vm1925_vm6, %v2268_v13, 0.0  ;;  %3065 = vtanh.f32 %v2259_v10 }
0x22ec   :  { %2279 = vrot.lane.b32.xlu1 %v2270_v14, %s3128_s15 }
0x22f5   :  { %v3066_v15 = vpop.eup %3065 }
0x22f6   :  { %v2261_v43 = vadd.f32 1.0, %v3066_v15 }
0x22f8   :  { %v2262_v16 = vmul.f32 0.5, %v2261_v43 }
0x22fa   :  { %v2264_v37 = vrot.slane %v2262_v16, 6 }
0x22fc   :  { %v2266_v62 = vsel %vm1925_vm6, %v2264_v37, 0.0 }
0x22fd   :  { %2275 = vrot.lane.b32.xlu0 %v2266_v62, %s3129_s16 }
0x235e   :  { %v2280_v17 = vpop.permute.xlu1 %2279 }
0x236f   :  { %v2276_v33 = vpop.permute.xlu0 %2275 }
0x2370   :  { %v2283_v18 = vsel %vm100_vm0, %v2282_v32, %v2276_v33 }
0x2371   :  { %v2285_v39 = vsel %vm2284_vm15, %v2283_v18, %v2280_v17 }
0x2372   :  { %v2286_v19 = vsel %vm289_vm3, %v2285_v39, 0.0 }
0x2373   :  { %2287 = vst [vmem:[#allocation5] sm:$0xff] %v2286_v19 }
0x2374   :  { %3100 = shalt.err (!%p3097_p12)
}
0x2375   :  { %s3101_s10 = scalar_lea.hbm %s3857_s17, 128 }
0x2376   :  { %p3102_p13 = scmp.ne.s32.totalorder %s3857_s17, %s3101_s10  ;;  %p3105_p0 = scmp.lt.u32.totalorder %s3101_s10, %s3857_s17 }
0x2378   :  { %p3107_p1 = pnand %p3105_p0, %p3102_p13 }
0x237a   :  { %3110 = shalt.err (!%p3107_p1)
}
0x237b   :  { %2297 = dma.vmem_to_hbm [thread:$0]  %s2295_s28, 128, %s3857_s17, [#allocation4]  }
0x237c   :  { %3113 = dma.done.wait [#allocation4], 128  }
0x237d   :  { %3114 = vsyncadd [#allocation4], 4294967168 }
0x237e   :  { %2301 = vsyncpa [#allocation3], 1 }
0x237f   :  { %2302 = vsyncpa [#allocation4], 1 }

</bundles_post_ra>
